<compile_context>
chip_gen: v5e
topology: v5e:2x2
jax: 0.10.0
libtpu: 0.0.40
codegen_flags: <defaults>
</compile_context>

<pallas_src>
import functools
import math

import jax
import jax.numpy as jnp
from jax import lax
from jax.experimental import pallas as pl
from jax.experimental.pallas import tpu as pltpu


def _attn_kernel(x_ref, mask_ref, wq_ref, wk_ref, wv_ref, wo_ref,
                 o_ref, k_sc, v_sc, *, heads: int, tq: int):
    # x_ref:    (Bt, S, E)  bf16 activations (full sequence of Bt batch rows)
    # mask_ref: (Bt, 1, S)  f32 attention mask {0,1}
    # w*_ref:   (E, E)      bf16, pre-transposed so y = x @ w (wq pre-scaled)
    # o_ref:    (Bt, tq, E) output tile
    # k_sc/v_sc:(Bt*S, E)   bf16 VMEM scratch, cached across query tiles
    f32, bf16 = jnp.float32, jnp.bfloat16
    Bt, S, E = x_ref.shape
    dh = E // heads

    qi = pl.program_id(1)

    # ---- K/V projections: once per batch block, cached across q-tiles. ----
    @pl.when(qi == 0)
    def _():
        x_flat = x_ref[...].reshape(Bt * S, E)                       # bf16
        k_sc[...] = jnp.dot(x_flat, wk_ref[...],
                            preferred_element_type=f32).astype(bf16)
        v_sc[...] = jnp.dot(x_flat, wv_ref[...],
                            preferred_element_type=f32).astype(bf16)

    # ---- Q projection for this tile's rows only (wq carries 1/sqrt(dh)). --
    q_start = pl.multiple_of(qi * tq, tq)
    xq = x_ref[:, pl.ds(q_start, tq), :].reshape(Bt * tq, E)         # bf16
    q = jnp.dot(xq, wq_ref[...], preferred_element_type=f32).astype(bf16)

    for b in range(Bt):
        # attention_bias = (1 - mask) * -1e12, f32, broadcast over queries.
        bias = (1.0 - mask_ref[b].astype(f32)) * jnp.float32(-1e12)  # (1, S)
        qb = q[b * tq:(b + 1) * tq, :]                               # (tq, E)

        head_outs = []
        # Heads are static lane-slices of the E axis — no (S,H,dh) transposes
        # and only one (tq, S) score slab is ever live.
        for h in range(heads):
            sl = slice(h * dh, (h + 1) * dh)
            qh = qb[:, sl]                                           # (tq, dh)
            kh = k_sc[b * S:(b + 1) * S, sl]                         # (S,  dh)
            vh = v_sc[b * S:(b + 1) * S, sl]                         # (S,  dh)

            # QK^T without materializing a transpose of kh.
            s = lax.dot_general(qh, kh, (((1,), (1,)), ((), ())),
                                preferred_element_type=f32)          # (tq, S)
            s = s + bias

            # Online-softmax numerics; exp in bf16 (EUP bf16 path on v6e/v7x).
            m = jnp.max(s, axis=-1, keepdims=True)
            p = jnp.exp((s - m).astype(bf16))                        # (tq, S)
            denom = jnp.sum(p.astype(f32), axis=-1, keepdims=True)   # (tq, 1)

            # PV with un-normalized probabilities; normalize the small output.
            oh = jnp.dot(p, vh, preferred_element_type=f32)          # (tq, dh)
            oh = oh * pl.reciprocal(denom, approx=True)
            head_outs.append(oh.astype(bf16))

        # Single full-depth output projection (contraction depth = E).
        head_out = jnp.concatenate(head_outs, axis=-1)               # (tq, E)
        ob = jnp.dot(head_out, wo_ref[...], preferred_element_type=f32)
        o_ref[b, :, :] = ob.astype(o_ref.dtype)


def _vmem_capacity_bytes() -> int:
    try:
        return int(pltpu.get_tpu_info().vmem_capacity_bytes)
    except Exception:
        return 128 << 20


def _pick_q_tile(S: int, vmem_cap: int) -> int:
    # tq=512 only on big-VMEM parts (v5e/v6e, 128 MiB); v7x (64 MiB) caps at 256.
    candidates = (512, 256, 128) if vmem_cap >= (100 << 20) else (256, 128)
    for t in candidates:
        if S % t == 0 and S > t:
            return t
    return S


def _pick_batch_tile(B: int, S: int, tq: int) -> int:
    # When the whole sequence fits one query tile, block batch rows so the
    # projection matmuls see M = Bt*S >= 256 rows (fills the MXU, fewer steps).
    if tq != S or S % 8 != 0:
        return 1
    bt = 1
    for cand in range(1, B + 1):
        if B % cand != 0 or cand * S > 1024:
            continue
        bt = cand
        if cand * S >= 256:
            break
    return bt


def encoder_self_attention(encoder_state, attention_mask,
                           wq, wk, wv, wo, *, attention_heads: int):
    """encoder_state: (B, S, E); attention_mask: (B, S) of {0,1};
       wq/wk/wv/wo: (E, E) PyTorch nn.Linear weights, layout (out, in)."""
    B, S, E = encoder_state.shape
    assert E % attention_heads == 0
    dh = E // attention_heads
    out_dtype = encoder_state.dtype
    out_isz = jnp.dtype(out_dtype).itemsize

    vmem_cap = _vmem_capacity_bytes()
    tq = _pick_q_tile(S, vmem_cap)
    num_q = S // tq
    bt = _pick_batch_tile(B, S, tq)
    num_b = B // bt

    # bf16 activations in the wrapper: halves HBM->VMEM DMA + pipeline VMEM.
    x_bf16 = encoder_state.astype(jnp.bfloat16)
    mask3 = attention_mask.reshape(B, 1, S).astype(jnp.float32)

    # Pre-transpose (kernel does x @ W == nn.Linear), fold 1/sqrt(dh) into wq,
    # cast to bf16 for the MXU.
    scale = 1.0 / math.sqrt(dh)
    wq_t = (wq.T * scale).astype(jnp.bfloat16)
    wk_t = wk.T.astype(jnp.bfloat16)
    wv_t = wv.T.astype(jnp.bfloat16)
    wo_t = wo.T.astype(jnp.bfloat16)

    kernel = functools.partial(_attn_kernel, heads=attention_heads, tq=tq)

    # Advisory cost estimate for XLA's scheduler.
    flops = 8 * B * S * E * E + 4 * B * S * S * E
    transcendentals = B * attention_heads * S * S
    bytes_accessed = (B * S * E * 2 + B * S * E * out_isz
                      + 4 * E * E * 2 + B * S * 4)
    cost = pl.CostEstimate(flops=int(flops),
                           transcendentals=int(transcendentals),
                           bytes_accessed=int(bytes_accessed))

    def make_vmem_limit(single_buffer_weights: bool) -> int:
        weight_bytes = 4 * E * E * 2 * (1 if single_buffer_weights else 2)
        x_bytes = 2 * bt * S * E * 2              # double-buffered bf16 block
        mask_bytes = 2 * bt * S * 4
        out_bytes = 2 * bt * tq * E * out_isz
        scratch_bytes = 2 * bt * S * E * 2        # K + V bf16 scratch
        inter_bytes = (2 * tq * S * 4             # score + prob slabs
                       + bt * tq * E * (2 + 2 + 4)  # q, head_out, f32 out-proj
                       + bt * S * E * 4)          # f32 K/V proj before cast
        est = (weight_bytes + x_bytes + mask_bytes + out_bytes
               + scratch_bytes + inter_bytes)
        cap = int(0.75 * vmem_cap)                # leave headroom (v7x: 64 MiB)
        limit = min(int(1.3 * est) + (8 << 20), cap)
        return max(limit, min(16 << 20, cap))

    def run(single_buffer_weights: bool):
        w_idx = lambda bi, qi: (0, 0)
        if single_buffer_weights:
            # Grid-invariant weights: one VMEM copy instead of two.
            w_spec = pl.BlockSpec((E, E), w_idx, pipeline_mode=pl.Buffered(1))
        else:
            w_spec = pl.BlockSpec((E, E), w_idx)

        grid_spec = pltpu.PrefetchScalarGridSpec(
            num_scalar_prefetch=0,
            grid=(num_b, num_q),
            in_specs=[
                # full sequence block of bt batch rows (queries sliced inside)
                pl.BlockSpec((bt, S, E), lambda bi, qi: (bi, 0, 0)),
                # mask along keys
                pl.BlockSpec((bt, 1, S), lambda bi, qi: (bi, 0, 0)),
                w_spec, w_spec, w_spec, w_spec,
            ],
            out_specs=pl.BlockSpec((bt, tq, E), lambda bi, qi: (bi, qi, 0)),
            scratch_shapes=[pltpu.VMEM((bt * S, E), jnp.bfloat16),   # K cache
                            pltpu.VMEM((bt * S, E), jnp.bfloat16)],  # V cache
        )
        return pl.pallas_call(
            kernel,
            out_shape=jax.ShapeDtypeStruct((B, S, E), out_dtype),
            grid_spec=grid_spec,
            compiler_params=pltpu.CompilerParams(
                # batch axis parallel (megacore), q-tile axis arbitrary so the
                # K/V scratch caching across tiles is valid.
                dimension_semantics=("parallel", "arbitrary"),
                vmem_limit_bytes=make_vmem_limit(single_buffer_weights)),
            cost_estimate=cost,
        )(x_bf16, mask3, wq_t, wk_t, wv_t, wo_t)

    try:
        return run(True)
    except Exception:
        # Fallback for builds rejecting pipeline_mode=pl.Buffered(1).
        # NOTE: if this wrapper is traced inside an outer jax.jit, lowering
        # errors surface at outer-compile time and this fallback cannot fire.
        return run(False)


def _reference(encoder_state, attention_mask, wq, wk, wv, wo, heads):
    # Plain-JAX reference mirroring the PyTorch forward (f32 math).
    B, S, E = encoder_state.shape
    dh = E // heads
    k = encoder_state @ wk.T
    v = encoder_state @ wv.T
    q = encoder_state @ wq.T
    k = k.reshape(B, S, heads, dh)
    v = v.reshape(B, S, heads, dh)
    q = q.reshape(B, S, heads, dh) / (dh ** 0.5)
    bias = (1.0 - attention_mask.astype(jnp.float32)) * -1e12
    w = jnp.einsum('bqhc,bkhc->bhqk', q, k) + bias[:, None, None, :]
    w = jax.nn.softmax(w, axis=-1)
    out = jnp.einsum('bhqk,bkhc->bqhc', w, v).reshape(B, S, E)
    return out @ wo.T


if __name__ == "__main__":
    B, S, E, H = 2, 8, 32, 4   # batch, seq, embed, heads (head_dim = 8)

    key = jax.random.PRNGKey(0)
    kx, km, k1, k2, k3, k4 = jax.random.split(key, 6)

    encoder_state = jax.random.normal(kx, (B, S, E), dtype=jnp.float32)
    # mask: 1 = attend, 0 = masked; ensure at least one valid key per row
    attention_mask = (jax.random.uniform(km, (B, S)) > 0.25).astype(jnp.float32)
    attention_mask = attention_mask.at[:, 0].set(1.0)

    wscale = 1.0 / (E ** 0.5)
    wq = jax.random.normal(k1, (E, E), dtype=jnp.float32) * wscale
    wk = jax.random.normal(k2, (E, E), dtype=jnp.float32) * wscale
    wv = jax.random.normal(k3, (E, E), dtype=jnp.float32) * wscale
    wo = jax.random.normal(k4, (E, E), dtype=jnp.float32) * wscale

    out = encoder_self_attention(encoder_state, attention_mask,
                                 wq, wk, wv, wo, attention_heads=H)
    out = jax.block_until_ready(out)

    ref = _reference(encoder_state, attention_mask, wq, wk, wv, wo, H)
    assert out.shape == (B, S, E)
    # bf16 MXU operands / bf16 exp -> looser tolerance vs f32 reference.
    max_err = float(jnp.max(jnp.abs(out - ref)))
    assert jnp.allclose(out, ref, atol=5e-2, rtol=5e-2), (
        f"mismatch vs reference (max abs err {max_err})")

    print("KERNEL_OK")
</pallas_src>

<mosaic_0001>
module attributes {stable_mosaic.version = 11 : i64} {
  func.func @_attn_kernel(%arg0: i32, %arg1: i32, %arg2: memref<2x8x32xbf16, #tpu.memory_space<vmem>>, %arg3: memref<2x1x8xf32, #tpu.memory_space<vmem>>, %arg4: memref<32x32xbf16, #tpu.memory_space<vmem>>, %arg5: memref<32x32xbf16, #tpu.memory_space<vmem>>, %arg6: memref<32x32xbf16, #tpu.memory_space<vmem>>, %arg7: memref<32x32xbf16, #tpu.memory_space<vmem>>, %arg8: memref<2x8x32xf32, #tpu.memory_space<vmem>>, %arg9: memref<16x32xbf16, #tpu.memory_space<vmem>>, %arg10: memref<16x32xbf16, #tpu.memory_space<vmem>>) attributes {dimension_semantics = [#tpu.dimension_semantics<parallel>, #tpu.dimension_semantics<arbitrary>], iteration_bounds = array<i64: 1, 1>, scalar_prefetch = 0 : i64, scratch_operands = 2 : i64, tpu.core_type = #tpu.core_type<tc>, window_params = [{transform_indices = @transform_0, window_bounds = array<i64: 2, 8, 32>}, {transform_indices = @transform_1, window_bounds = array<i64: 2, 1, 8>}, {pipeline_mode = #tpu.pipeline_mode<synchronous>, transform_indices = @transform_2, window_bounds = array<i64: 32, 32>}, {pipeline_mode = #tpu.pipeline_mode<synchronous>, transform_indices = @transform_3, window_bounds = array<i64: 32, 32>}, {pipeline_mode = #tpu.pipeline_mode<synchronous>, transform_indices = @transform_4, window_bounds = array<i64: 32, 32>}, {pipeline_mode = #tpu.pipeline_mode<synchronous>, transform_indices = @transform_5, window_bounds = array<i64: 32, 32>}, {transform_indices = @transform_6, window_bounds = array<i64: 2, 8, 32>}]} {
    %c0_i32 = arith.constant 0 : i32
    %0 = arith.cmpi eq, %arg1, %c0_i32 : i32
    %1 = arith.extui %0 : i1 to i32
    %c0_i32_0 = arith.constant 0 : i32
    %2 = arith.cmpi ne, %1, %c0_i32_0 : i32
    scf.if %2 {
      %c0_86 = arith.constant 0 : index
      %c0_87 = arith.constant 0 : index
      %c0_88 = arith.constant 0 : index
      %197 = vector.load %arg2[%c0_86, %c0_87, %c0_88] : memref<2x8x32xbf16, #tpu.memory_space<vmem>>, vector<2x8x32xbf16>
      %198 = vector.shape_cast %197 : vector<2x8x32xbf16> to vector<16x32xbf16>
      %c0_89 = arith.constant 0 : index
      %c0_90 = arith.constant 0 : index
      %199 = vector.load %arg5[%c0_89, %c0_90] : memref<32x32xbf16, #tpu.memory_space<vmem>>, vector<32x32xbf16>
      %cst_91 = arith.constant dense<0.000000e+00> : vector<16x32xf32>
      %200 = tpu.matmul %198, %199, %cst_91 {dimension_numbers = #tpu.dot_dimension_numbers<[1], [0], [0], [1], [0, 0, 1, 1], [], []>} : vector<16x32xbf16>, vector<32x32xbf16>, vector<16x32xf32> -> vector<16x32xf32>
      %201 = arith.truncf %200 : vector<16x32xf32> to vector<16x32xbf16>
      %c0_92 = arith.constant 0 : index
      %c0_93 = arith.constant 0 : index
      %202 = vector.load %arg9[%c0_92, %c0_93] : memref<16x32xbf16, #tpu.memory_space<vmem>>, vector<16x32xbf16>
      tpu.vector_store %arg9[%c0_92, %c0_93], %201 {strides = array<i32>} : memref<16x32xbf16, #tpu.memory_space<vmem>>, vector<16x32xbf16>,
      %c0_94 = arith.constant 0 : index
      %c0_95 = arith.constant 0 : index
      %203 = vector.load %arg6[%c0_94, %c0_95] : memref<32x32xbf16, #tpu.memory_space<vmem>>, vector<32x32xbf16>
      %cst_96 = arith.constant dense<0.000000e+00> : vector<16x32xf32>
      %204 = tpu.matmul %198, %203, %cst_96 {dimension_numbers = #tpu.dot_dimension_numbers<[1], [0], [0], [1], [0, 0, 1, 1], [], []>} : vector<16x32xbf16>, vector<32x32xbf16>, vector<16x32xf32> -> vector<16x32xf32>
      %205 = arith.truncf %204 : vector<16x32xf32> to vector<16x32xbf16>
      %c0_97 = arith.constant 0 : index
      %c0_98 = arith.constant 0 : index
      %206 = vector.load %arg10[%c0_97, %c0_98] : memref<16x32xbf16, #tpu.memory_space<vmem>>, vector<16x32xbf16>
      tpu.vector_store %arg10[%c0_97, %c0_98], %205 {strides = array<i32>} : memref<16x32xbf16, #tpu.memory_space<vmem>>, vector<16x32xbf16>,
    } else {
    }
    %c8_i32 = arith.constant 8 : i32
    %3 = arith.muli %arg1, %c8_i32 : i32
    %4 = tpu.assume_multiple %3, 8 : i32
    %c0 = arith.constant 0 : index
    %5 = arith.index_cast %4 : i32 to index
    %c0_1 = arith.constant 0 : index
    %6 = vector.load %arg2[%c0, %5, %c0_1] : memref<2x8x32xbf16, #tpu.memory_space<vmem>>, vector<2x8x32xbf16>
    %7 = vector.shape_cast %6 : vector<2x8x32xbf16> to vector<16x32xbf16>
    %c0_2 = arith.constant 0 : index
    %c0_3 = arith.constant 0 : index
    %8 = vector.load %arg4[%c0_2, %c0_3] : memref<32x32xbf16, #tpu.memory_space<vmem>>, vector<32x32xbf16>
    %cst = arith.constant dense<0.000000e+00> : vector<16x32xf32>
    %9 = tpu.matmul %7, %8, %cst {dimension_numbers = #tpu.dot_dimension_numbers<[1], [0], [0], [1], [0, 0, 1, 1], [], []>} : vector<16x32xbf16>, vector<32x32xbf16>, vector<16x32xf32> -> vector<16x32xf32>
    %10 = arith.truncf %9 : vector<16x32xf32> to vector<16x32xbf16>
    %c0_4 = arith.constant 0 : index
    %c0_5 = arith.constant 0 : index
    %c0_6 = arith.constant 0 : index
    %11 = vector.load %arg3[%c0_4, %c0_5, %c0_6] : memref<2x1x8xf32, #tpu.memory_space<vmem>>, vector<1x1x8xf32>
    %12 = vector.shape_cast %11 : vector<1x1x8xf32> to vector<1x8xf32>
    %cst_7 = arith.constant 1.000000e+00 : f32
    %13 = vector.broadcast %cst_7 : f32 to vector<1x8xf32>
    %14 = arith.subf %13, %12 : vector<1x8xf32>
    %cst_8 = arith.constant -9.99999995E+11 : f32
    %15 = vector.broadcast %cst_8 : f32 to vector<1x8xf32>
    %16 = arith.mulf %14, %15 : vector<1x8xf32>
    %17 = vector.extract_strided_slice %10 {offsets = [0, 0], sizes = [8, 32], strides = [1, 1]} : vector<16x32xbf16> to vector<8x32xbf16>
    %18 = vector.extract_strided_slice %17 {offsets = [0, 0], sizes = [8, 8], strides = [1, 1]} : vector<8x32xbf16> to vector<8x8xbf16>
    %c0_9 = arith.constant 0 : index
    %c0_10 = arith.constant 0 : index
    %19 = vector.load %arg9[%c0_9, %c0_10] : memref<16x32xbf16, #tpu.memory_space<vmem>>, vector<8x8xbf16>
    %c0_11 = arith.constant 0 : index
    %c0_12 = arith.constant 0 : index
    %20 = vector.load %arg10[%c0_11, %c0_12] : memref<16x32xbf16, #tpu.memory_space<vmem>>, vector<8x8xbf16>
    %cst_13 = arith.constant dense<0.000000e+00> : vector<8x8xf32>
    %21 = tpu.matmul %18, %19, %cst_13 {dimension_numbers = #tpu.dot_dimension_numbers<[1], [1], [0], [0], [0, 0, 1, 0], [], []>} : vector<8x8xbf16>, vector<8x8xbf16>, vector<8x8xf32> -> vector<8x8xf32>
    %22 = vector.broadcast %16 : vector<1x8xf32> to vector<8x8xf32>
    %23 = arith.addf %21, %22 : vector<8x8xf32>
    %cst_14 = arith.constant dense<0xFF800000> : vector<8xf32>
    %24 = vector.multi_reduction <maximumf>, %23, %cst_14 [1] : vector<8x8xf32> to vector<8xf32>
    %25 = vector.shape_cast %24 : vector<8xf32> to vector<8x1xf32>
    %26 = vector.broadcast %25 : vector<8x1xf32> to vector<8x8xf32>
    %27 = arith.subf %23, %26 : vector<8x8xf32>
    %28 = arith.truncf %27 : vector<8x8xf32> to vector<8x8xbf16>
    %29 = math.exp %28 : vector<8x8xbf16>
    %30 = arith.extf %29 : vector<8x8xbf16> to vector<8x8xf32>
    %cst_15 = arith.constant dense<0.000000e+00> : vector<8xf32>
    %31 = vector.multi_reduction <add>, %30, %cst_15 [1] : vector<8x8xf32> to vector<8xf32>
    %32 = vector.shape_cast %31 : vector<8xf32> to vector<8x1xf32>
    %cst_16 = arith.constant dense<0.000000e+00> : vector<8x8xf32>
    %33 = tpu.matmul %29, %20, %cst_16 {dimension_numbers = #tpu.dot_dimension_numbers<[1], [0], [0], [1], [0, 0, 1, 1], [], []>} : vector<8x8xbf16>, vector<8x8xbf16>, vector<8x8xf32> -> vector<8x8xf32>
    %34 = tpu.reciprocal %32 {approx = true} : vector<8x1xf32> -> vector<8x1xf32>
    %35 = vector.broadcast %34 : vector<8x1xf32> to vector<8x8xf32>
    %36 = arith.mulf %33, %35 : vector<8x8xf32>
    %37 = arith.truncf %36 : vector<8x8xf32> to vector<8x8xbf16>
    %38 = vector.extract_strided_slice %17 {offsets = [0, 8], sizes = [8, 8], strides = [1, 1]} : vector<8x32xbf16> to vector<8x8xbf16>
    %c0_17 = arith.constant 0 : index
    %c8 = arith.constant 8 : index
    %39 = vector.load %arg9[%c0_17, %c8] : memref<16x32xbf16, #tpu.memory_space<vmem>>, vector<8x8xbf16>
    %c0_18 = arith.constant 0 : index
    %c8_19 = arith.constant 8 : index
    %40 = vector.load %arg10[%c0_18, %c8_19] : memref<16x32xbf16, #tpu.memory_space<vmem>>, vector<8x8xbf16>
    %cst_20 = arith.constant dense<0.000000e+00> : vector<8x8xf32>
    %41 = tpu.matmul %38, %39, %cst_20 {dimension_numbers = #tpu.dot_dimension_numbers<[1], [1], [0], [0], [0, 0, 1, 0], [], []>} : vector<8x8xbf16>, vector<8x8xbf16>, vector<8x8xf32> -> vector<8x8xf32>
    %42 = vector.broadcast %16 : vector<1x8xf32> to vector<8x8xf32>
    %43 = arith.addf %41, %42 : vector<8x8xf32>
    %cst_21 = arith.constant dense<0xFF800000> : vector<8xf32>
    %44 = vector.multi_reduction <maximumf>, %43, %cst_21 [1] : vector<8x8xf32> to vector<8xf32>
    %45 = vector.shape_cast %44 : vector<8xf32> to vector<8x1xf32>
    %46 = vector.broadcast %45 : vector<8x1xf32> to vector<8x8xf32>
    %47 = arith.subf %43, %46 : vector<8x8xf32>
    %48 = arith.truncf %47 : vector<8x8xf32> to vector<8x8xbf16>
    %49 = math.exp %48 : vector<8x8xbf16>
    %50 = arith.extf %49 : vector<8x8xbf16> to vector<8x8xf32>
    %cst_22 = arith.constant dense<0.000000e+00> : vector<8xf32>
    %51 = vector.multi_reduction <add>, %50, %cst_22 [1] : vector<8x8xf32> to vector<8xf32>
    %52 = vector.shape_cast %51 : vector<8xf32> to vector<8x1xf32>
    %cst_23 = arith.constant dense<0.000000e+00> : vector<8x8xf32>
    %53 = tpu.matmul %49, %40, %cst_23 {dimension_numbers = #tpu.dot_dimension_numbers<[1], [0], [0], [1], [0, 0, 1, 1], [], []>} : vector<8x8xbf16>, vector<8x8xbf16>, vector<8x8xf32> -> vector<8x8xf32>
    %54 = tpu.reciprocal %52 {approx = true} : vector<8x1xf32> -> vector<8x1xf32>
    %55 = vector.broadcast %54 : vector<8x1xf32> to vector<8x8xf32>
    %56 = arith.mulf %53, %55 : vector<8x8xf32>
    %57 = arith.truncf %56 : vector<8x8xf32> to vector<8x8xbf16>
    %58 = vector.extract_strided_slice %17 {offsets = [0, 16], sizes = [8, 8], strides = [1, 1]} : vector<8x32xbf16> to vector<8x8xbf16>
    %c0_24 = arith.constant 0 : index
    %c16 = arith.constant 16 : index
    %59 = vector.load %arg9[%c0_24, %c16] : memref<16x32xbf16, #tpu.memory_space<vmem>>, vector<8x8xbf16>
    %c0_25 = arith.constant 0 : index
    %c16_26 = arith.constant 16 : index
    %60 = vector.load %arg10[%c0_25, %c16_26] : memref<16x32xbf16, #tpu.memory_space<vmem>>, vector<8x8xbf16>
    %cst_27 = arith.constant dense<0.000000e+00> : vector<8x8xf32>
    %61 = tpu.matmul %58, %59, %cst_27 {dimension_numbers = #tpu.dot_dimension_numbers<[1], [1], [0], [0], [0, 0, 1, 0], [], []>} : vector<8x8xbf16>, vector<8x8xbf16>, vector<8x8xf32> -> vector<8x8xf32>
    %62 = vector.broadcast %16 : vector<1x8xf32> to vector<8x8xf32>
    %63 = arith.addf %61, %62 : vector<8x8xf32>
    %cst_28 = arith.constant dense<0xFF800000> : vector<8xf32>
    %64 = vector.multi_reduction <maximumf>, %63, %cst_28 [1] : vector<8x8xf32> to vector<8xf32>
    %65 = vector.shape_cast %64 : vector<8xf32> to vector<8x1xf32>
    %66 = vector.broadcast %65 : vector<8x1xf32> to vector<8x8xf32>
    %67 = arith.subf %63, %66 : vector<8x8xf32>
    %68 = arith.truncf %67 : vector<8x8xf32> to vector<8x8xbf16>
    %69 = math.exp %68 : vector<8x8xbf16>
    %70 = arith.extf %69 : vector<8x8xbf16> to vector<8x8xf32>
    %cst_29 = arith.constant dense<0.000000e+00> : vector<8xf32>
    %71 = vector.multi_reduction <add>, %70, %cst_29 [1] : vector<8x8xf32> to vector<8xf32>
    %72 = vector.shape_cast %71 : vector<8xf32> to vector<8x1xf32>
    %cst_30 = arith.constant dense<0.000000e+00> : vector<8x8xf32>
    %73 = tpu.matmul %69, %60, %cst_30 {dimension_numbers = #tpu.dot_dimension_numbers<[1], [0], [0], [1], [0, 0, 1, 1], [], []>} : vector<8x8xbf16>, vector<8x8xbf16>, vector<8x8xf32> -> vector<8x8xf32>
    %74 = tpu.reciprocal %72 {approx = true} : vector<8x1xf32> -> vector<8x1xf32>
    %75 = vector.broadcast %74 : vector<8x1xf32> to vector<8x8xf32>
    %76 = arith.mulf %73, %75 : vector<8x8xf32>
    %77 = arith.truncf %76 : vector<8x8xf32> to vector<8x8xbf16>
    %78 = vector.extract_strided_slice %17 {offsets = [0, 24], sizes = [8, 8], strides = [1, 1]} : vector<8x32xbf16> to vector<8x8xbf16>
    %c0_31 = arith.constant 0 : index
    %c24 = arith.constant 24 : index
    %79 = vector.load %arg9[%c0_31, %c24] : memref<16x32xbf16, #tpu.memory_space<vmem>>, vector<8x8xbf16>
    %c0_32 = arith.constant 0 : index
    %c24_33 = arith.constant 24 : index
    %80 = vector.load %arg10[%c0_32, %c24_33] : memref<16x32xbf16, #tpu.memory_space<vmem>>, vector<8x8xbf16>
    %cst_34 = arith.constant dense<0.000000e+00> : vector<8x8xf32>
    %81 = tpu.matmul %78, %79, %cst_34 {dimension_numbers = #tpu.dot_dimension_numbers<[1], [1], [0], [0], [0, 0, 1, 0], [], []>} : vector<8x8xbf16>, vector<8x8xbf16>, vector<8x8xf32> -> vector<8x8xf32>
    %82 = vector.broadcast %16 : vector<1x8xf32> to vector<8x8xf32>
    %83 = arith.addf %81, %82 : vector<8x8xf32>
    %cst_35 = arith.constant dense<0xFF800000> : vector<8xf32>
    %84 = vector.multi_reduction <maximumf>, %83, %cst_35 [1] : vector<8x8xf32> to vector<8xf32>
    %85 = vector.shape_cast %84 : vector<8xf32> to vector<8x1xf32>
    %86 = vector.broadcast %85 : vector<8x1xf32> to vector<8x8xf32>
    %87 = arith.subf %83, %86 : vector<8x8xf32>
    %88 = arith.truncf %87 : vector<8x8xf32> to vector<8x8xbf16>
    %89 = math.exp %88 : vector<8x8xbf16>
    %90 = arith.extf %89 : vector<8x8xbf16> to vector<8x8xf32>
    %cst_36 = arith.constant dense<0.000000e+00> : vector<8xf32>
    %91 = vector.multi_reduction <add>, %90, %cst_36 [1] : vector<8x8xf32> to vector<8xf32>
    %92 = vector.shape_cast %91 : vector<8xf32> to vector<8x1xf32>
    %cst_37 = arith.constant dense<0.000000e+00> : vector<8x8xf32>
    %93 = tpu.matmul %89, %80, %cst_37 {dimension_numbers = #tpu.dot_dimension_numbers<[1], [0], [0], [1], [0, 0, 1, 1], [], []>} : vector<8x8xbf16>, vector<8x8xbf16>, vector<8x8xf32> -> vector<8x8xf32>
    %94 = tpu.reciprocal %92 {approx = true} : vector<8x1xf32> -> vector<8x1xf32>
    %95 = vector.broadcast %94 : vector<8x1xf32> to vector<8x8xf32>
    %96 = arith.mulf %93, %95 : vector<8x8xf32>
    %97 = arith.truncf %96 : vector<8x8xf32> to vector<8x8xbf16>
    %98 = tpu.concatenate %37, %57, %77, %97 in 1 : vector<8x8xbf16>, vector<8x8xbf16>, vector<8x8xbf16>, vector<8x8xbf16> -> vector<8x32xbf16>
    %c0_38 = arith.constant 0 : index
    %c0_39 = arith.constant 0 : index
    %99 = vector.load %arg7[%c0_38, %c0_39] : memref<32x32xbf16, #tpu.memory_space<vmem>>, vector<32x32xbf16>
    %cst_40 = arith.constant dense<0.000000e+00> : vector<8x32xf32>
    %100 = tpu.matmul %98, %99, %cst_40 {dimension_numbers = #tpu.dot_dimension_numbers<[1], [0], [0], [1], [0, 0, 1, 1], [], []>} : vector<8x32xbf16>, vector<32x32xbf16>, vector<8x32xf32> -> vector<8x32xf32>
    %c0_41 = arith.constant 0 : index
    %c0_42 = arith.constant 0 : index
    %c0_43 = arith.constant 0 : index
    %101 = vector.load %arg8[%c0_41, %c0_42, %c0_43] : memref<2x8x32xf32, #tpu.memory_space<vmem>>, vector<1x8x32xf32>
    %102 = vector.shape_cast %101 : vector<1x8x32xf32> to vector<8x32xf32>
    %103 = vector.shape_cast %100 : vector<8x32xf32> to vector<1x8x32xf32>
    tpu.vector_store %arg8[%c0_41, %c0_42, %c0_43], %103 {strides = array<i32>} : memref<2x8x32xf32, #tpu.memory_space<vmem>>, vector<1x8x32xf32>,
    %c1 = arith.constant 1 : index
    %c0_44 = arith.constant 0 : index
    %c0_45 = arith.constant 0 : index
    %104 = vector.load %arg3[%c1, %c0_44, %c0_45] : memref<2x1x8xf32, #tpu.memory_space<vmem>>, vector<1x1x8xf32>
    %105 = vector.shape_cast %104 : vector<1x1x8xf32> to vector<1x8xf32>
    %cst_46 = arith.constant 1.000000e+00 : f32
    %106 = vector.broadcast %cst_46 : f32 to vector<1x8xf32>
    %107 = arith.subf %106, %105 : vector<1x8xf32>
    %cst_47 = arith.constant -9.99999995E+11 : f32
    %108 = vector.broadcast %cst_47 : f32 to vector<1x8xf32>
    %109 = arith.mulf %107, %108 : vector<1x8xf32>
    %110 = vector.extract_strided_slice %10 {offsets = [8, 0], sizes = [8, 32], strides = [1, 1]} : vector<16x32xbf16> to vector<8x32xbf16>
    %111 = vector.extract_strided_slice %110 {offsets = [0, 0], sizes = [8, 8], strides = [1, 1]} : vector<8x32xbf16> to vector<8x8xbf16>
    %c8_48 = arith.constant 8 : index
    %c0_49 = arith.constant 0 : index
    %112 = vector.load %arg9[%c8_48, %c0_49] : memref<16x32xbf16, #tpu.memory_space<vmem>>, vector<8x8xbf16>
    %c8_50 = arith.constant 8 : index
    %c0_51 = arith.constant 0 : index
    %113 = vector.load %arg10[%c8_50, %c0_51] : memref<16x32xbf16, #tpu.memory_space<vmem>>, vector<8x8xbf16>
    %cst_52 = arith.constant dense<0.000000e+00> : vector<8x8xf32>
    %114 = tpu.matmul %111, %112, %cst_52 {dimension_numbers = #tpu.dot_dimension_numbers<[1], [1], [0], [0], [0, 0, 1, 0], [], []>} : vector<8x8xbf16>, vector<8x8xbf16>, vector<8x8xf32> -> vector<8x8xf32>
    %115 = vector.broadcast %109 : vector<1x8xf32> to vector<8x8xf32>
    %116 = arith.addf %114, %115 : vector<8x8xf32>
    %cst_53 = arith.constant dense<0xFF800000> : vector<8xf32>
    %117 = vector.multi_reduction <maximumf>, %116, %cst_53 [1] : vector<8x8xf32> to vector<8xf32>
    %118 = vector.shape_cast %117 : vector<8xf32> to vector<8x1xf32>
    %119 = vector.broadcast %118 : vector<8x1xf32> to vector<8x8xf32>
    %120 = arith.subf %116, %119 : vector<8x8xf32>
    %121 = arith.truncf %120 : vector<8x8xf32> to vector<8x8xbf16>
    %122 = math.exp %121 : vector<8x8xbf16>
    %123 = arith.extf %122 : vector<8x8xbf16> to vector<8x8xf32>
    %cst_54 = arith.constant dense<0.000000e+00> : vector<8xf32>
    %124 = vector.multi_reduction <add>, %123, %cst_54 [1] : vector<8x8xf32> to vector<8xf32>
    %125 = vector.shape_cast %124 : vector<8xf32> to vector<8x1xf32>
    %cst_55 = arith.constant dense<0.000000e+00> : vector<8x8xf32>
    %126 = tpu.matmul %122, %113, %cst_55 {dimension_numbers = #tpu.dot_dimension_numbers<[1], [0], [0], [1], [0, 0, 1, 1], [], []>} : vector<8x8xbf16>, vector<8x8xbf16>, vector<8x8xf32> -> vector<8x8xf32>
    %127 = tpu.reciprocal %125 {approx = true} : vector<8x1xf32> -> vector<8x1xf32>
    %128 = vector.broadcast %127 : vector<8x1xf32> to vector<8x8xf32>
    %129 = arith.mulf %126, %128 : vector<8x8xf32>
    %130 = arith.truncf %129 : vector<8x8xf32> to vector<8x8xbf16>
    %131 = vector.extract_strided_slice %110 {offsets = [0, 8], sizes = [8, 8], strides = [1, 1]} : vector<8x32xbf16> to vector<8x8xbf16>
    %c8_56 = arith.constant 8 : index
    %c8_57 = arith.constant 8 : index
    %132 = vector.load %arg9[%c8_56, %c8_57] : memref<16x32xbf16, #tpu.memory_space<vmem>>, vector<8x8xbf16>
    %c8_58 = arith.constant 8 : index
    %c8_59 = arith.constant 8 : index
    %133 = vector.load %arg10[%c8_58, %c8_59] : memref<16x32xbf16, #tpu.memory_space<vmem>>, vector<8x8xbf16>
    %cst_60 = arith.constant dense<0.000000e+00> : vector<8x8xf32>
    %134 = tpu.matmul %131, %132, %cst_60 {dimension_numbers = #tpu.dot_dimension_numbers<[1], [1], [0], [0], [0, 0, 1, 0], [], []>} : vector<8x8xbf16>, vector<8x8xbf16>, vector<8x8xf32> -> vector<8x8xf32>
    %135 = vector.broadcast %109 : vector<1x8xf32> to vector<8x8xf32>
    %136 = arith.addf %134, %135 : vector<8x8xf32>
    %cst_61 = arith.constant dense<0xFF800000> : vector<8xf32>
    %137 = vector.multi_reduction <maximumf>, %136, %cst_61 [1] : vector<8x8xf32> to vector<8xf32>
    %138 = vector.shape_cast %137 : vector<8xf32> to vector<8x1xf32>
    %139 = vector.broadcast %138 : vector<8x1xf32> to vector<8x8xf32>
    %140 = arith.subf %136, %139 : vector<8x8xf32>
    %141 = arith.truncf %140 : vector<8x8xf32> to vector<8x8xbf16>
    %142 = math.exp %141 : vector<8x8xbf16>
    %143 = arith.extf %142 : vector<8x8xbf16> to vector<8x8xf32>
    %cst_62 = arith.constant dense<0.000000e+00> : vector<8xf32>
    %144 = vector.multi_reduction <add>, %143, %cst_62 [1] : vector<8x8xf32> to vector<8xf32>
    %145 = vector.shape_cast %144 : vector<8xf32> to vector<8x1xf32>
    %cst_63 = arith.constant dense<0.000000e+00> : vector<8x8xf32>
    %146 = tpu.matmul %142, %133, %cst_63 {dimension_numbers = #tpu.dot_dimension_numbers<[1], [0], [0], [1], [0, 0, 1, 1], [], []>} : vector<8x8xbf16>, vector<8x8xbf16>, vector<8x8xf32> -> vector<8x8xf32>
    %147 = tpu.reciprocal %145 {approx = true} : vector<8x1xf32> -> vector<8x1xf32>
    %148 = vector.broadcast %147 : vector<8x1xf32> to vector<8x8xf32>
    %149 = arith.mulf %146, %148 : vector<8x8xf32>
    %150 = arith.truncf %149 : vector<8x8xf32> to vector<8x8xbf16>
    %151 = vector.extract_strided_slice %110 {offsets = [0, 16], sizes = [8, 8], strides = [1, 1]} : vector<8x32xbf16> to vector<8x8xbf16>
    %c8_64 = arith.constant 8 : index
    %c16_65 = arith.constant 16 : index
    %152 = vector.load %arg9[%c8_64, %c16_65] : memref<16x32xbf16, #tpu.memory_space<vmem>>, vector<8x8xbf16>
    %c8_66 = arith.constant 8 : index
    %c16_67 = arith.constant 16 : index
    %153 = vector.load %arg10[%c8_66, %c16_67] : memref<16x32xbf16, #tpu.memory_space<vmem>>, vector<8x8xbf16>
    %cst_68 = arith.constant dense<0.000000e+00> : vector<8x8xf32>
    %154 = tpu.matmul %151, %152, %cst_68 {dimension_numbers = #tpu.dot_dimension_numbers<[1], [1], [0], [0], [0, 0, 1, 0], [], []>} : vector<8x8xbf16>, vector<8x8xbf16>, vector<8x8xf32> -> vector<8x8xf32>
    %155 = vector.broadcast %109 : vector<1x8xf32> to vector<8x8xf32>
    %156 = arith.addf %154, %155 : vector<8x8xf32>
    %cst_69 = arith.constant dense<0xFF800000> : vector<8xf32>
    %157 = vector.multi_reduction <maximumf>, %156, %cst_69 [1] : vector<8x8xf32> to vector<8xf32>
    %158 = vector.shape_cast %157 : vector<8xf32> to vector<8x1xf32>
    %159 = vector.broadcast %158 : vector<8x1xf32> to vector<8x8xf32>
    %160 = arith.subf %156, %159 : vector<8x8xf32>
    %161 = arith.truncf %160 : vector<8x8xf32> to vector<8x8xbf16>
    %162 = math.exp %161 : vector<8x8xbf16>
    %163 = arith.extf %162 : vector<8x8xbf16> to vector<8x8xf32>
    %cst_70 = arith.constant dense<0.000000e+00> : vector<8xf32>
    %164 = vector.multi_reduction <add>, %163, %cst_70 [1] : vector<8x8xf32> to vector<8xf32>
    %165 = vector.shape_cast %164 : vector<8xf32> to vector<8x1xf32>
    %cst_71 = arith.constant dense<0.000000e+00> : vector<8x8xf32>
    %166 = tpu.matmul %162, %153, %cst_71 {dimension_numbers = #tpu.dot_dimension_numbers<[1], [0], [0], [1], [0, 0, 1, 1], [], []>} : vector<8x8xbf16>, vector<8x8xbf16>, vector<8x8xf32> -> vector<8x8xf32>
    %167 = tpu.reciprocal %165 {approx = true} : vector<8x1xf32> -> vector<8x1xf32>
    %168 = vector.broadcast %167 : vector<8x1xf32> to vector<8x8xf32>
    %169 = arith.mulf %166, %168 : vector<8x8xf32>
    %170 = arith.truncf %169 : vector<8x8xf32> to vector<8x8xbf16>
    %171 = vector.extract_strided_slice %110 {offsets = [0, 24], sizes = [8, 8], strides = [1, 1]} : vector<8x32xbf16> to vector<8x8xbf16>
    %c8_72 = arith.constant 8 : index
    %c24_73 = arith.constant 24 : index
    %172 = vector.load %arg9[%c8_72, %c24_73] : memref<16x32xbf16, #tpu.memory_space<vmem>>, vector<8x8xbf16>
    %c8_74 = arith.constant 8 : index
    %c24_75 = arith.constant 24 : index
    %173 = vector.load %arg10[%c8_74, %c24_75] : memref<16x32xbf16, #tpu.memory_space<vmem>>, vector<8x8xbf16>
    %cst_76 = arith.constant dense<0.000000e+00> : vector<8x8xf32>
    %174 = tpu.matmul %171, %172, %cst_76 {dimension_numbers = #tpu.dot_dimension_numbers<[1], [1], [0], [0], [0, 0, 1, 0], [], []>} : vector<8x8xbf16>, vector<8x8xbf16>, vector<8x8xf32> -> vector<8x8xf32>
    %175 = vector.broadcast %109 : vector<1x8xf32> to vector<8x8xf32>
    %176 = arith.addf %174, %175 : vector<8x8xf32>
    %cst_77 = arith.constant dense<0xFF800000> : vector<8xf32>
    %177 = vector.multi_reduction <maximumf>, %176, %cst_77 [1] : vector<8x8xf32> to vector<8xf32>
    %178 = vector.shape_cast %177 : vector<8xf32> to vector<8x1xf32>
    %179 = vector.broadcast %178 : vector<8x1xf32> to vector<8x8xf32>
    %180 = arith.subf %176, %179 : vector<8x8xf32>
    %181 = arith.truncf %180 : vector<8x8xf32> to vector<8x8xbf16>
    %182 = math.exp %181 : vector<8x8xbf16>
    %183 = arith.extf %182 : vector<8x8xbf16> to vector<8x8xf32>
    %cst_78 = arith.constant dense<0.000000e+00> : vector<8xf32>
    %184 = vector.multi_reduction <add>, %183, %cst_78 [1] : vector<8x8xf32> to vector<8xf32>
    %185 = vector.shape_cast %184 : vector<8xf32> to vector<8x1xf32>
    %cst_79 = arith.constant dense<0.000000e+00> : vector<8x8xf32>
    %186 = tpu.matmul %182, %173, %cst_79 {dimension_numbers = #tpu.dot_dimension_numbers<[1], [0], [0], [1], [0, 0, 1, 1], [], []>} : vector<8x8xbf16>, vector<8x8xbf16>, vector<8x8xf32> -> vector<8x8xf32>
    %187 = tpu.reciprocal %185 {approx = true} : vector<8x1xf32> -> vector<8x1xf32>
    %188 = vector.broadcast %187 : vector<8x1xf32> to vector<8x8xf32>
    %189 = arith.mulf %186, %188 : vector<8x8xf32>
    %190 = arith.truncf %189 : vector<8x8xf32> to vector<8x8xbf16>
    %191 = tpu.concatenate %130, %150, %170, %190 in 1 : vector<8x8xbf16>, vector<8x8xbf16>, vector<8x8xbf16>, vector<8x8xbf16> -> vector<8x32xbf16>
    %c0_80 = arith.constant 0 : index
    %c0_81 = arith.constant 0 : index
    %192 = vector.load %arg7[%c0_80, %c0_81] : memref<32x32xbf16, #tpu.memory_space<vmem>>, vector<32x32xbf16>
    %cst_82 = arith.constant dense<0.000000e+00> : vector<8x32xf32>
    %193 = tpu.matmul %191, %192, %cst_82 {dimension_numbers = #tpu.dot_dimension_numbers<[1], [0], [0], [1], [0, 0, 1, 1], [], []>} : vector<8x32xbf16>, vector<32x32xbf16>, vector<8x32xf32> -> vector<8x32xf32>
    %c1_83 = arith.constant 1 : index
    %c0_84 = arith.constant 0 : index
    %c0_85 = arith.constant 0 : index
    %194 = vector.load %arg8[%c1_83, %c0_84, %c0_85] : memref<2x8x32xf32, #tpu.memory_space<vmem>>, vector<1x8x32xf32>
    %195 = vector.shape_cast %194 : vector<1x8x32xf32> to vector<8x32xf32>
    %196 = vector.shape_cast %193 : vector<8x32xf32> to vector<1x8x32xf32>
    tpu.vector_store %arg8[%c1_83, %c0_84, %c0_85], %196 {strides = array<i32>} : memref<2x8x32xf32, #tpu.memory_space<vmem>>, vector<1x8x32xf32>,
    return
  }
  func.func @transform_0(%arg0: i32, %arg1: i32) -> (i32, i32, i32) {
    %c0_i32 = arith.constant 0 : i32
    %c0_i32_0 = arith.constant 0 : i32
    %c0_i32_1 = arith.constant 0 : i32
    return %arg0, %c0_i32, %c0_i32_0 : i32, i32, i32
  }
  func.func @transform_1(%arg0: i32, %arg1: i32) -> (i32, i32, i32) {
    %c0_i32 = arith.constant 0 : i32
    %c0_i32_0 = arith.constant 0 : i32
    %c0_i32_1 = arith.constant 0 : i32
    return %arg0, %c0_i32, %c0_i32_0 : i32, i32, i32
  }
  func.func @transform_2(%arg0: i32, %arg1: i32) -> (i32, i32) {
    %c0_i32 = arith.constant 0 : i32
    %c0_i32_0 = arith.constant 0 : i32
    %c0_i32_1 = arith.constant 0 : i32
    return %c0_i32, %c0_i32_0 : i32, i32
  }
  func.func @transform_3(%arg0: i32, %arg1: i32) -> (i32, i32) {
    %c0_i32 = arith.constant 0 : i32
    %c0_i32_0 = arith.constant 0 : i32
    %c0_i32_1 = arith.constant 0 : i32
    return %c0_i32, %c0_i32_0 : i32, i32
  }
  func.func @transform_4(%arg0: i32, %arg1: i32) -> (i32, i32) {
    %c0_i32 = arith.constant 0 : i32
    %c0_i32_0 = arith.constant 0 : i32
    %c0_i32_1 = arith.constant 0 : i32
    return %c0_i32, %c0_i32_0 : i32, i32
  }
  func.func @transform_5(%arg0: i32, %arg1: i32) -> (i32, i32) {
    %c0_i32 = arith.constant 0 : i32
    %c0_i32_0 = arith.constant 0 : i32
    %c0_i32_1 = arith.constant 0 : i32
    return %c0_i32, %c0_i32_0 : i32, i32
  }
  func.func @transform_6(%arg0: i32, %arg1: i32) -> (i32, i32, i32) {
    %c0_i32 = arith.constant 0 : i32
    %c0_i32_0 = arith.constant 0 : i32
    return %arg0, %arg1, %c0_i32 : i32, i32, i32
  }
}

module attributes {stable_mosaic.version = 11 : i64} {
  func.func @_attn_kernel(%arg0: i32, %arg1: i32, %arg2: memref<2x8x32xbf16, #tpu.memory_space<vmem>>, %arg3: memref<2x1x8xf32, #tpu.memory_space<vmem>>, %arg4: memref<32x32xbf16, #tpu.memory_space<vmem>>, %arg5: memref<32x32xbf16, #tpu.memory_space<vmem>>, %arg6: memref<32x32xbf16, #tpu.memory_space<vmem>>, %arg7: memref<32x32xbf16, #tpu.memory_space<vmem>>, %arg8: memref<2x8x32xf32, #tpu.memory_space<vmem>>, %arg9: memref<16x32xbf16, #tpu.memory_space<vmem>>, %arg10: memref<16x32xbf16, #tpu.memory_space<vmem>>) attributes {dimension_semantics = [#tpu.dimension_semantics<parallel>, #tpu.dimension_semantics<arbitrary>], iteration_bounds = array<i64: 1, 1>, scalar_prefetch = 0 : i64, scratch_operands = 2 : i64, tpu.core_type = #tpu.core_type<tc>, window_params = [{transform_indices = @transform_0, window_bounds = array<i64: 2, 8, 32>}, {transform_indices = @transform_1, window_bounds = array<i64: 2, 1, 8>}, {pipeline_mode = #tpu.pipeline_mode<synchronous>, transform_indices = @transform_2, window_bounds = array<i64: 32, 32>}, {pipeline_mode = #tpu.pipeline_mode<synchronous>, transform_indices = @transform_3, window_bounds = array<i64: 32, 32>}, {pipeline_mode = #tpu.pipeline_mode<synchronous>, transform_indices = @transform_4, window_bounds = array<i64: 32, 32>}, {pipeline_mode = #tpu.pipeline_mode<synchronous>, transform_indices = @transform_5, window_bounds = array<i64: 32, 32>}, {transform_indices = @transform_6, window_bounds = array<i64: 2, 8, 32>}]} {
    %c0_i32 = arith.constant 0 : i32
    %0 = arith.cmpi eq, %arg1, %c0_i32 : i32
    %1 = arith.extui %0 : i1 to i32
    %c0_i32_0 = arith.constant 0 : i32
    %2 = arith.cmpi ne, %1, %c0_i32_0 : i32
    scf.if %2 {
      %c0_86 = arith.constant 0 : index
      %c0_87 = arith.constant 0 : index
      %c0_88 = arith.constant 0 : index
      %197 = vector.load %arg2[%c0_86, %c0_87, %c0_88] : memref<2x8x32xbf16, #tpu.memory_space<vmem>>, vector<2x8x32xbf16>
      %198 = vector.shape_cast %197 : vector<2x8x32xbf16> to vector<16x32xbf16>
      %c0_89 = arith.constant 0 : index
      %c0_90 = arith.constant 0 : index
      %199 = vector.load %arg5[%c0_89, %c0_90] : memref<32x32xbf16, #tpu.memory_space<vmem>>, vector<32x32xbf16>
      %cst_91 = arith.constant dense<0.000000e+00> : vector<16x32xf32>
      %200 = tpu.matmul %198, %199, %cst_91 {dimension_numbers = #tpu.dot_dimension_numbers<[1], [0], [0], [1], [0, 0, 1, 1], [], []>} : vector<16x32xbf16>, vector<32x32xbf16>, vector<16x32xf32> -> vector<16x32xf32>
      %201 = arith.truncf %200 : vector<16x32xf32> to vector<16x32xbf16>
      %c0_92 = arith.constant 0 : index
      %c0_93 = arith.constant 0 : index
      %202 = vector.load %arg9[%c0_92, %c0_93] : memref<16x32xbf16, #tpu.memory_space<vmem>>, vector<16x32xbf16>
      tpu.vector_store %arg9[%c0_92, %c0_93], %201 {strides = array<i32>} : memref<16x32xbf16, #tpu.memory_space<vmem>>, vector<16x32xbf16>,
      %c0_94 = arith.constant 0 : index
      %c0_95 = arith.constant 0 : index
      %203 = vector.load %arg6[%c0_94, %c0_95] : memref<32x32xbf16, #tpu.memory_space<vmem>>, vector<32x32xbf16>
      %cst_96 = arith.constant dense<0.000000e+00> : vector<16x32xf32>
      %204 = tpu.matmul %198, %203, %cst_96 {dimension_numbers = #tpu.dot_dimension_numbers<[1], [0], [0], [1], [0, 0, 1, 1], [], []>} : vector<16x32xbf16>, vector<32x32xbf16>, vector<16x32xf32> -> vector<16x32xf32>
      %205 = arith.truncf %204 : vector<16x32xf32> to vector<16x32xbf16>
      %c0_97 = arith.constant 0 : index
      %c0_98 = arith.constant 0 : index
      %206 = vector.load %arg10[%c0_97, %c0_98] : memref<16x32xbf16, #tpu.memory_space<vmem>>, vector<16x32xbf16>
      tpu.vector_store %arg10[%c0_97, %c0_98], %205 {strides = array<i32>} : memref<16x32xbf16, #tpu.memory_space<vmem>>, vector<16x32xbf16>,
    } else {
    }
    %c8_i32 = arith.constant 8 : i32
    %3 = arith.muli %arg1, %c8_i32 : i32
    %4 = tpu.assume_multiple %3, 8 : i32
    %c0 = arith.constant 0 : index
    %5 = arith.index_cast %4 : i32 to index
    %c0_1 = arith.constant 0 : index
    %6 = vector.load %arg2[%c0, %5, %c0_1] : memref<2x8x32xbf16, #tpu.memory_space<vmem>>, vector<2x8x32xbf16>
    %7 = vector.shape_cast %6 : vector<2x8x32xbf16> to vector<16x32xbf16>
    %c0_2 = arith.constant 0 : index
    %c0_3 = arith.constant 0 : index
    %8 = vector.load %arg4[%c0_2, %c0_3] : memref<32x32xbf16, #tpu.memory_space<vmem>>, vector<32x32xbf16>
    %cst = arith.constant dense<0.000000e+00> : vector<16x32xf32>
    %9 = tpu.matmul %7, %8, %cst {dimension_numbers = #tpu.dot_dimension_numbers<[1], [0], [0], [1], [0, 0, 1, 1], [], []>} : vector<16x32xbf16>, vector<32x32xbf16>, vector<16x32xf32> -> vector<16x32xf32>
    %10 = arith.truncf %9 : vector<16x32xf32> to vector<16x32xbf16>
    %c0_4 = arith.constant 0 : index
    %c0_5 = arith.constant 0 : index
    %c0_6 = arith.constant 0 : index
    %11 = vector.load %arg3[%c0_4, %c0_5, %c0_6] : memref<2x1x8xf32, #tpu.memory_space<vmem>>, vector<1x1x8xf32>
    %12 = vector.shape_cast %11 : vector<1x1x8xf32> to vector<1x8xf32>
    %cst_7 = arith.constant 1.000000e+00 : f32
    %13 = vector.broadcast %cst_7 : f32 to vector<1x8xf32>
    %14 = arith.subf %13, %12 : vector<1x8xf32>
    %cst_8 = arith.constant -9.99999995E+11 : f32
    %15 = vector.broadcast %cst_8 : f32 to vector<1x8xf32>
    %16 = arith.mulf %14, %15 : vector<1x8xf32>
    %17 = vector.extract_strided_slice %10 {offsets = [0, 0], sizes = [8, 32], strides = [1, 1]} : vector<16x32xbf16> to vector<8x32xbf16>
    %18 = vector.extract_strided_slice %17 {offsets = [0, 0], sizes = [8, 8], strides = [1, 1]} : vector<8x32xbf16> to vector<8x8xbf16>
    %c0_9 = arith.constant 0 : index
    %c0_10 = arith.constant 0 : index
    %19 = vector.load %arg9[%c0_9, %c0_10] : memref<16x32xbf16, #tpu.memory_space<vmem>>, vector<8x8xbf16>
    %c0_11 = arith.constant 0 : index
    %c0_12 = arith.constant 0 : index
    %20 = vector.load %arg10[%c0_11, %c0_12] : memref<16x32xbf16, #tpu.memory_space<vmem>>, vector<8x8xbf16>
    %cst_13 = arith.constant dense<0.000000e+00> : vector<8x8xf32>
    %21 = tpu.matmul %18, %19, %cst_13 {dimension_numbers = #tpu.dot_dimension_numbers<[1], [1], [0], [0], [0, 0, 1, 0], [], []>} : vector<8x8xbf16>, vector<8x8xbf16>, vector<8x8xf32> -> vector<8x8xf32>
    %22 = vector.broadcast %16 : vector<1x8xf32> to vector<8x8xf32>
    %23 = arith.addf %21, %22 : vector<8x8xf32>
    %cst_14 = arith.constant dense<0xFF800000> : vector<8xf32>
    %24 = vector.multi_reduction <maximumf>, %23, %cst_14 [1] : vector<8x8xf32> to vector<8xf32>
    %25 = vector.shape_cast %24 : vector<8xf32> to vector<8x1xf32>
    %26 = vector.broadcast %25 : vector<8x1xf32> to vector<8x8xf32>
    %27 = arith.subf %23, %26 : vector<8x8xf32>
    %28 = arith.truncf %27 : vector<8x8xf32> to vector<8x8xbf16>
    %29 = math.exp %28 : vector<8x8xbf16>
    %30 = arith.extf %29 : vector<8x8xbf16> to vector<8x8xf32>
    %cst_15 = arith.constant dense<0.000000e+00> : vector<8xf32>
    %31 = vector.multi_reduction <add>, %30, %cst_15 [1] : vector<8x8xf32> to vector<8xf32>
    %32 = vector.shape_cast %31 : vector<8xf32> to vector<8x1xf32>
    %cst_16 = arith.constant dense<0.000000e+00> : vector<8x8xf32>
    %33 = tpu.matmul %29, %20, %cst_16 {dimension_numbers = #tpu.dot_dimension_numbers<[1], [0], [0], [1], [0, 0, 1, 1], [], []>} : vector<8x8xbf16>, vector<8x8xbf16>, vector<8x8xf32> -> vector<8x8xf32>
    %34 = tpu.reciprocal %32 {approx = true} : vector<8x1xf32> -> vector<8x1xf32>
    %35 = vector.broadcast %34 : vector<8x1xf32> to vector<8x8xf32>
    %36 = arith.mulf %33, %35 : vector<8x8xf32>
    %37 = arith.truncf %36 : vector<8x8xf32> to vector<8x8xbf16>
    %38 = vector.extract_strided_slice %17 {offsets = [0, 8], sizes = [8, 8], strides = [1, 1]} : vector<8x32xbf16> to vector<8x8xbf16>
    %c0_17 = arith.constant 0 : index
    %c8 = arith.constant 8 : index
    %39 = vector.load %arg9[%c0_17, %c8] : memref<16x32xbf16, #tpu.memory_space<vmem>>, vector<8x8xbf16>
    %c0_18 = arith.constant 0 : index
    %c8_19 = arith.constant 8 : index
    %40 = vector.load %arg10[%c0_18, %c8_19] : memref<16x32xbf16, #tpu.memory_space<vmem>>, vector<8x8xbf16>
    %cst_20 = arith.constant dense<0.000000e+00> : vector<8x8xf32>
    %41 = tpu.matmul %38, %39, %cst_20 {dimension_numbers = #tpu.dot_dimension_numbers<[1], [1], [0], [0], [0, 0, 1, 0], [], []>} : vector<8x8xbf16>, vector<8x8xbf16>, vector<8x8xf32> -> vector<8x8xf32>
    %42 = vector.broadcast %16 : vector<1x8xf32> to vector<8x8xf32>
    %43 = arith.addf %41, %42 : vector<8x8xf32>
    %cst_21 = arith.constant dense<0xFF800000> : vector<8xf32>
    %44 = vector.multi_reduction <maximumf>, %43, %cst_21 [1] : vector<8x8xf32> to vector<8xf32>
    %45 = vector.shape_cast %44 : vector<8xf32> to vector<8x1xf32>
    %46 = vector.broadcast %45 : vector<8x1xf32> to vector<8x8xf32>
    %47 = arith.subf %43, %46 : vector<8x8xf32>
    %48 = arith.truncf %47 : vector<8x8xf32> to vector<8x8xbf16>
    %49 = math.exp %48 : vector<8x8xbf16>
    %50 = arith.extf %49 : vector<8x8xbf16> to vector<8x8xf32>
    %cst_22 = arith.constant dense<0.000000e+00> : vector<8xf32>
    %51 = vector.multi_reduction <add>, %50, %cst_22 [1] : vector<8x8xf32> to vector<8xf32>
    %52 = vector.shape_cast %51 : vector<8xf32> to vector<8x1xf32>
    %cst_23 = arith.constant dense<0.000000e+00> : vector<8x8xf32>
    %53 = tpu.matmul %49, %40, %cst_23 {dimension_numbers = #tpu.dot_dimension_numbers<[1], [0], [0], [1], [0, 0, 1, 1], [], []>} : vector<8x8xbf16>, vector<8x8xbf16>, vector<8x8xf32> -> vector<8x8xf32>
    %54 = tpu.reciprocal %52 {approx = true} : vector<8x1xf32> -> vector<8x1xf32>
    %55 = vector.broadcast %54 : vector<8x1xf32> to vector<8x8xf32>
    %56 = arith.mulf %53, %55 : vector<8x8xf32>
    %57 = arith.truncf %56 : vector<8x8xf32> to vector<8x8xbf16>
    %58 = vector.extract_strided_slice %17 {offsets = [0, 16], sizes = [8, 8], strides = [1, 1]} : vector<8x32xbf16> to vector<8x8xbf16>
    %c0_24 = arith.constant 0 : index
    %c16 = arith.constant 16 : index
    %59 = vector.load %arg9[%c0_24, %c16] : memref<16x32xbf16, #tpu.memory_space<vmem>>, vector<8x8xbf16>
    %c0_25 = arith.constant 0 : index
    %c16_26 = arith.constant 16 : index
    %60 = vector.load %arg10[%c0_25, %c16_26] : memref<16x32xbf16, #tpu.memory_space<vmem>>, vector<8x8xbf16>
    %cst_27 = arith.constant dense<0.000000e+00> : vector<8x8xf32>
    %61 = tpu.matmul %58, %59, %cst_27 {dimension_numbers = #tpu.dot_dimension_numbers<[1], [1], [0], [0], [0, 0, 1, 0], [], []>} : vector<8x8xbf16>, vector<8x8xbf16>, vector<8x8xf32> -> vector<8x8xf32>
    %62 = vector.broadcast %16 : vector<1x8xf32> to vector<8x8xf32>
    %63 = arith.addf %61, %62 : vector<8x8xf32>
    %cst_28 = arith.constant dense<0xFF800000> : vector<8xf32>
    %64 = vector.multi_reduction <maximumf>, %63, %cst_28 [1] : vector<8x8xf32> to vector<8xf32>
    %65 = vector.shape_cast %64 : vector<8xf32> to vector<8x1xf32>
    %66 = vector.broadcast %65 : vector<8x1xf32> to vector<8x8xf32>
    %67 = arith.subf %63, %66 : vector<8x8xf32>
    %68 = arith.truncf %67 : vector<8x8xf32> to vector<8x8xbf16>
    %69 = math.exp %68 : vector<8x8xbf16>
    %70 = arith.extf %69 : vector<8x8xbf16> to vector<8x8xf32>
    %cst_29 = arith.constant dense<0.000000e+00> : vector<8xf32>
    %71 = vector.multi_reduction <add>, %70, %cst_29 [1] : vector<8x8xf32> to vector<8xf32>
    %72 = vector.shape_cast %71 : vector<8xf32> to vector<8x1xf32>
    %cst_30 = arith.constant dense<0.000000e+00> : vector<8x8xf32>
    %73 = tpu.matmul %69, %60, %cst_30 {dimension_numbers = #tpu.dot_dimension_numbers<[1], [0], [0], [1], [0, 0, 1, 1], [], []>} : vector<8x8xbf16>, vector<8x8xbf16>, vector<8x8xf32> -> vector<8x8xf32>
    %74 = tpu.reciprocal %72 {approx = true} : vector<8x1xf32> -> vector<8x1xf32>
    %75 = vector.broadcast %74 : vector<8x1xf32> to vector<8x8xf32>
    %76 = arith.mulf %73, %75 : vector<8x8xf32>
    %77 = arith.truncf %76 : vector<8x8xf32> to vector<8x8xbf16>
    %78 = vector.extract_strided_slice %17 {offsets = [0, 24], sizes = [8, 8], strides = [1, 1]} : vector<8x32xbf16> to vector<8x8xbf16>
    %c0_31 = arith.constant 0 : index
    %c24 = arith.constant 24 : index
    %79 = vector.load %arg9[%c0_31, %c24] : memref<16x32xbf16, #tpu.memory_space<vmem>>, vector<8x8xbf16>
    %c0_32 = arith.constant 0 : index
    %c24_33 = arith.constant 24 : index
    %80 = vector.load %arg10[%c0_32, %c24_33] : memref<16x32xbf16, #tpu.memory_space<vmem>>, vector<8x8xbf16>
    %cst_34 = arith.constant dense<0.000000e+00> : vector<8x8xf32>
    %81 = tpu.matmul %78, %79, %cst_34 {dimension_numbers = #tpu.dot_dimension_numbers<[1], [1], [0], [0], [0, 0, 1, 0], [], []>} : vector<8x8xbf16>, vector<8x8xbf16>, vector<8x8xf32> -> vector<8x8xf32>
    %82 = vector.broadcast %16 : vector<1x8xf32> to vector<8x8xf32>
    %83 = arith.addf %81, %82 : vector<8x8xf32>
    %cst_35 = arith.constant dense<0xFF800000> : vector<8xf32>
    %84 = vector.multi_reduction <maximumf>, %83, %cst_35 [1] : vector<8x8xf32> to vector<8xf32>
    %85 = vector.shape_cast %84 : vector<8xf32> to vector<8x1xf32>
    %86 = vector.broadcast %85 : vector<8x1xf32> to vector<8x8xf32>
    %87 = arith.subf %83, %86 : vector<8x8xf32>
    %88 = arith.truncf %87 : vector<8x8xf32> to vector<8x8xbf16>
    %89 = math.exp %88 : vector<8x8xbf16>
    %90 = arith.extf %89 : vector<8x8xbf16> to vector<8x8xf32>
    %cst_36 = arith.constant dense<0.000000e+00> : vector<8xf32>
    %91 = vector.multi_reduction <add>, %90, %cst_36 [1] : vector<8x8xf32> to vector<8xf32>
    %92 = vector.shape_cast %91 : vector<8xf32> to vector<8x1xf32>
    %cst_37 = arith.constant dense<0.000000e+00> : vector<8x8xf32>
    %93 = tpu.matmul %89, %80, %cst_37 {dimension_numbers = #tpu.dot_dimension_numbers<[1], [0], [0], [1], [0, 0, 1, 1], [], []>} : vector<8x8xbf16>, vector<8x8xbf16>, vector<8x8xf32> -> vector<8x8xf32>
    %94 = tpu.reciprocal %92 {approx = true} : vector<8x1xf32> -> vector<8x1xf32>
    %95 = vector.broadcast %94 : vector<8x1xf32> to vector<8x8xf32>
    %96 = arith.mulf %93, %95 : vector<8x8xf32>
    %97 = arith.truncf %96 : vector<8x8xf32> to vector<8x8xbf16>
    %98 = tpu.concatenate %37, %57, %77, %97 in 1 : vector<8x8xbf16>, vector<8x8xbf16>, vector<8x8xbf16>, vector<8x8xbf16> -> vector<8x32xbf16>
    %c0_38 = arith.constant 0 : index
    %c0_39 = arith.constant 0 : index
    %99 = vector.load %arg7[%c0_38, %c0_39] : memref<32x32xbf16, #tpu.memory_space<vmem>>, vector<32x32xbf16>
    %cst_40 = arith.constant dense<0.000000e+00> : vector<8x32xf32>
    %100 = tpu.matmul %98, %99, %cst_40 {dimension_numbers = #tpu.dot_dimension_numbers<[1], [0], [0], [1], [0, 0, 1, 1], [], []>} : vector<8x32xbf16>, vector<32x32xbf16>, vector<8x32xf32> -> vector<8x32xf32>
    %c0_41 = arith.constant 0 : index
    %c0_42 = arith.constant 0 : index
    %c0_43 = arith.constant 0 : index
    %101 = vector.load %arg8[%c0_41, %c0_42, %c0_43] : memref<2x8x32xf32, #tpu.memory_space<vmem>>, vector<1x8x32xf32>
    %102 = vector.shape_cast %101 : vector<1x8x32xf32> to vector<8x32xf32>
    %103 = vector.shape_cast %100 : vector<8x32xf32> to vector<1x8x32xf32>
    tpu.vector_store %arg8[%c0_41, %c0_42, %c0_43], %103 {strides = array<i32>} : memref<2x8x32xf32, #tpu.memory_space<vmem>>, vector<1x8x32xf32>,
    %c1 = arith.constant 1 : index
    %c0_44 = arith.constant 0 : index
    %c0_45 = arith.constant 0 : index
    %104 = vector.load %arg3[%c1, %c0_44, %c0_45] : memref<2x1x8xf32, #tpu.memory_space<vmem>>, vector<1x1x8xf32>
    %105 = vector.shape_cast %104 : vector<1x1x8xf32> to vector<1x8xf32>
    %cst_46 = arith.constant 1.000000e+00 : f32
    %106 = vector.broadcast %cst_46 : f32 to vector<1x8xf32>
    %107 = arith.subf %106, %105 : vector<1x8xf32>
    %cst_47 = arith.constant -9.99999995E+11 : f32
    %108 = vector.broadcast %cst_47 : f32 to vector<1x8xf32>
    %109 = arith.mulf %107, %108 : vector<1x8xf32>
    %110 = vector.extract_strided_slice %10 {offsets = [8, 0], sizes = [8, 32], strides = [1, 1]} : vector<16x32xbf16> to vector<8x32xbf16>
    %111 = vector.extract_strided_slice %110 {offsets = [0, 0], sizes = [8, 8], strides = [1, 1]} : vector<8x32xbf16> to vector<8x8xbf16>
    %c8_48 = arith.constant 8 : index
    %c0_49 = arith.constant 0 : index
    %112 = vector.load %arg9[%c8_48, %c0_49] : memref<16x32xbf16, #tpu.memory_space<vmem>>, vector<8x8xbf16>
    %c8_50 = arith.constant 8 : index
    %c0_51 = arith.constant 0 : index
    %113 = vector.load %arg10[%c8_50, %c0_51] : memref<16x32xbf16, #tpu.memory_space<vmem>>, vector<8x8xbf16>
    %cst_52 = arith.constant dense<0.000000e+00> : vector<8x8xf32>
    %114 = tpu.matmul %111, %112, %cst_52 {dimension_numbers = #tpu.dot_dimension_numbers<[1], [1], [0], [0], [0, 0, 1, 0], [], []>} : vector<8x8xbf16>, vector<8x8xbf16>, vector<8x8xf32> -> vector<8x8xf32>
    %115 = vector.broadcast %109 : vector<1x8xf32> to vector<8x8xf32>
    %116 = arith.addf %114, %115 : vector<8x8xf32>
    %cst_53 = arith.constant dense<0xFF800000> : vector<8xf32>
    %117 = vector.multi_reduction <maximumf>, %116, %cst_53 [1] : vector<8x8xf32> to vector<8xf32>
    %118 = vector.shape_cast %117 : vector<8xf32> to vector<8x1xf32>
    %119 = vector.broadcast %118 : vector<8x1xf32> to vector<8x8xf32>
    %120 = arith.subf %116, %119 : vector<8x8xf32>
    %121 = arith.truncf %120 : vector<8x8xf32> to vector<8x8xbf16>
    %122 = math.exp %121 : vector<8x8xbf16>
    %123 = arith.extf %122 : vector<8x8xbf16> to vector<8x8xf32>
    %cst_54 = arith.constant dense<0.000000e+00> : vector<8xf32>
    %124 = vector.multi_reduction <add>, %123, %cst_54 [1] : vector<8x8xf32> to vector<8xf32>
    %125 = vector.shape_cast %124 : vector<8xf32> to vector<8x1xf32>
    %cst_55 = arith.constant dense<0.000000e+00> : vector<8x8xf32>
    %126 = tpu.matmul %122, %113, %cst_55 {dimension_numbers = #tpu.dot_dimension_numbers<[1], [0], [0], [1], [0, 0, 1, 1], [], []>} : vector<8x8xbf16>, vector<8x8xbf16>, vector<8x8xf32> -> vector<8x8xf32>
    %127 = tpu.reciprocal %125 {approx = true} : vector<8x1xf32> -> vector<8x1xf32>
    %128 = vector.broadcast %127 : vector<8x1xf32> to vector<8x8xf32>
    %129 = arith.mulf %126, %128 : vector<8x8xf32>
    %130 = arith.truncf %129 : vector<8x8xf32> to vector<8x8xbf16>
    %131 = vector.extract_strided_slice %110 {offsets = [0, 8], sizes = [8, 8], strides = [1, 1]} : vector<8x32xbf16> to vector<8x8xbf16>
    %c8_56 = arith.constant 8 : index
    %c8_57 = arith.constant 8 : index
    %132 = vector.load %arg9[%c8_56, %c8_57] : memref<16x32xbf16, #tpu.memory_space<vmem>>, vector<8x8xbf16>
    %c8_58 = arith.constant 8 : index
    %c8_59 = arith.constant 8 : index
    %133 = vector.load %arg10[%c8_58, %c8_59] : memref<16x32xbf16, #tpu.memory_space<vmem>>, vector<8x8xbf16>
    %cst_60 = arith.constant dense<0.000000e+00> : vector<8x8xf32>
    %134 = tpu.matmul %131, %132, %cst_60 {dimension_numbers = #tpu.dot_dimension_numbers<[1], [1], [0], [0], [0, 0, 1, 0], [], []>} : vector<8x8xbf16>, vector<8x8xbf16>, vector<8x8xf32> -> vector<8x8xf32>
    %135 = vector.broadcast %109 : vector<1x8xf32> to vector<8x8xf32>
    %136 = arith.addf %134, %135 : vector<8x8xf32>
    %cst_61 = arith.constant dense<0xFF800000> : vector<8xf32>
    %137 = vector.multi_reduction <maximumf>, %136, %cst_61 [1] : vector<8x8xf32> to vector<8xf32>
    %138 = vector.shape_cast %137 : vector<8xf32> to vector<8x1xf32>
    %139 = vector.broadcast %138 : vector<8x1xf32> to vector<8x8xf32>
    %140 = arith.subf %136, %139 : vector<8x8xf32>
    %141 = arith.truncf %140 : vector<8x8xf32> to vector<8x8xbf16>
    %142 = math.exp %141 : vector<8x8xbf16>
    %143 = arith.extf %142 : vector<8x8xbf16> to vector<8x8xf32>
    %cst_62 = arith.constant dense<0.000000e+00> : vector<8xf32>
    %144 = vector.multi_reduction <add>, %143, %cst_62 [1] : vector<8x8xf32> to vector<8xf32>
    %145 = vector.shape_cast %144 : vector<8xf32> to vector<8x1xf32>
    %cst_63 = arith.constant dense<0.000000e+00> : vector<8x8xf32>
    %146 = tpu.matmul %142, %133, %cst_63 {dimension_numbers = #tpu.dot_dimension_numbers<[1], [0], [0], [1], [0, 0, 1, 1], [], []>} : vector<8x8xbf16>, vector<8x8xbf16>, vector<8x8xf32> -> vector<8x8xf32>
    %147 = tpu.reciprocal %145 {approx = true} : vector<8x1xf32> -> vector<8x1xf32>
    %148 = vector.broadcast %147 : vector<8x1xf32> to vector<8x8xf32>
    %149 = arith.mulf %146, %148 : vector<8x8xf32>
    %150 = arith.truncf %149 : vector<8x8xf32> to vector<8x8xbf16>
    %151 = vector.extract_strided_slice %110 {offsets = [0, 16], sizes = [8, 8], strides = [1, 1]} : vector<8x32xbf16> to vector<8x8xbf16>
    %c8_64 = arith.constant 8 : index
    %c16_65 = arith.constant 16 : index
    %152 = vector.load %arg9[%c8_64, %c16_65] : memref<16x32xbf16, #tpu.memory_space<vmem>>, vector<8x8xbf16>
    %c8_66 = arith.constant 8 : index
    %c16_67 = arith.constant 16 : index
    %153 = vector.load %arg10[%c8_66, %c16_67] : memref<16x32xbf16, #tpu.memory_space<vmem>>, vector<8x8xbf16>
    %cst_68 = arith.constant dense<0.000000e+00> : vector<8x8xf32>
    %154 = tpu.matmul %151, %152, %cst_68 {dimension_numbers = #tpu.dot_dimension_numbers<[1], [1], [0], [0], [0, 0, 1, 0], [], []>} : vector<8x8xbf16>, vector<8x8xbf16>, vector<8x8xf32> -> vector<8x8xf32>
    %155 = vector.broadcast %109 : vector<1x8xf32> to vector<8x8xf32>
    %156 = arith.addf %154, %155 : vector<8x8xf32>
    %cst_69 = arith.constant dense<0xFF800000> : vector<8xf32>
    %157 = vector.multi_reduction <maximumf>, %156, %cst_69 [1] : vector<8x8xf32> to vector<8xf32>
    %158 = vector.shape_cast %157 : vector<8xf32> to vector<8x1xf32>
    %159 = vector.broadcast %158 : vector<8x1xf32> to vector<8x8xf32>
    %160 = arith.subf %156, %159 : vector<8x8xf32>
    %161 = arith.truncf %160 : vector<8x8xf32> to vector<8x8xbf16>
    %162 = math.exp %161 : vector<8x8xbf16>
    %163 = arith.extf %162 : vector<8x8xbf16> to vector<8x8xf32>
    %cst_70 = arith.constant dense<0.000000e+00> : vector<8xf32>
    %164 = vector.multi_reduction <add>, %163, %cst_70 [1] : vector<8x8xf32> to vector<8xf32>
    %165 = vector.shape_cast %164 : vector<8xf32> to vector<8x1xf32>
    %cst_71 = arith.constant dense<0.000000e+00> : vector<8x8xf32>
    %166 = tpu.matmul %162, %153, %cst_71 {dimension_numbers = #tpu.dot_dimension_numbers<[1], [0], [0], [1], [0, 0, 1, 1], [], []>} : vector<8x8xbf16>, vector<8x8xbf16>, vector<8x8xf32> -> vector<8x8xf32>
    %167 = tpu.reciprocal %165 {approx = true} : vector<8x1xf32> -> vector<8x1xf32>
    %168 = vector.broadcast %167 : vector<8x1xf32> to vector<8x8xf32>
    %169 = arith.mulf %166, %168 : vector<8x8xf32>
    %170 = arith.truncf %169 : vector<8x8xf32> to vector<8x8xbf16>
    %171 = vector.extract_strided_slice %110 {offsets = [0, 24], sizes = [8, 8], strides = [1, 1]} : vector<8x32xbf16> to vector<8x8xbf16>
    %c8_72 = arith.constant 8 : index
    %c24_73 = arith.constant 24 : index
    %172 = vector.load %arg9[%c8_72, %c24_73] : memref<16x32xbf16, #tpu.memory_space<vmem>>, vector<8x8xbf16>
    %c8_74 = arith.constant 8 : index
    %c24_75 = arith.constant 24 : index
    %173 = vector.load %arg10[%c8_74, %c24_75] : memref<16x32xbf16, #tpu.memory_space<vmem>>, vector<8x8xbf16>
    %cst_76 = arith.constant dense<0.000000e+00> : vector<8x8xf32>
    %174 = tpu.matmul %171, %172, %cst_76 {dimension_numbers = #tpu.dot_dimension_numbers<[1], [1], [0], [0], [0, 0, 1, 0], [], []>} : vector<8x8xbf16>, vector<8x8xbf16>, vector<8x8xf32> -> vector<8x8xf32>
    %175 = vector.broadcast %109 : vector<1x8xf32> to vector<8x8xf32>
    %176 = arith.addf %174, %175 : vector<8x8xf32>
    %cst_77 = arith.constant dense<0xFF800000> : vector<8xf32>
    %177 = vector.multi_reduction <maximumf>, %176, %cst_77 [1] : vector<8x8xf32> to vector<8xf32>
    %178 = vector.shape_cast %177 : vector<8xf32> to vector<8x1xf32>
    %179 = vector.broadcast %178 : vector<8x1xf32> to vector<8x8xf32>
    %180 = arith.subf %176, %179 : vector<8x8xf32>
    %181 = arith.truncf %180 : vector<8x8xf32> to vector<8x8xbf16>
    %182 = math.exp %181 : vector<8x8xbf16>
    %183 = arith.extf %182 : vector<8x8xbf16> to vector<8x8xf32>
    %cst_78 = arith.constant dense<0.000000e+00> : vector<8xf32>
    %184 = vector.multi_reduction <add>, %183, %cst_78 [1] : vector<8x8xf32> to vector<8xf32>
    %185 = vector.shape_cast %184 : vector<8xf32> to vector<8x1xf32>
    %cst_79 = arith.constant dense<0.000000e+00> : vector<8x8xf32>
    %186 = tpu.matmul %182, %173, %cst_79 {dimension_numbers = #tpu.dot_dimension_numbers<[1], [0], [0], [1], [0, 0, 1, 1], [], []>} : vector<8x8xbf16>, vector<8x8xbf16>, vector<8x8xf32> -> vector<8x8xf32>
    %187 = tpu.reciprocal %185 {approx = true} : vector<8x1xf32> -> vector<8x1xf32>
    %188 = vector.broadcast %187 : vector<8x1xf32> to vector<8x8xf32>
    %189 = arith.mulf %186, %188 : vector<8x8xf32>
    %190 = arith.truncf %189 : vector<8x8xf32> to vector<8x8xbf16>
    %191 = tpu.concatenate %130, %150, %170, %190 in 1 : vector<8x8xbf16>, vector<8x8xbf16>, vector<8x8xbf16>, vector<8x8xbf16> -> vector<8x32xbf16>
    %c0_80 = arith.constant 0 : index
    %c0_81 = arith.constant 0 : index
    %192 = vector.load %arg7[%c0_80, %c0_81] : memref<32x32xbf16, #tpu.memory_space<vmem>>, vector<32x32xbf16>
    %cst_82 = arith.constant dense<0.000000e+00> : vector<8x32xf32>
    %193 = tpu.matmul %191, %192, %cst_82 {dimension_numbers = #tpu.dot_dimension_numbers<[1], [0], [0], [1], [0, 0, 1, 1], [], []>} : vector<8x32xbf16>, vector<32x32xbf16>, vector<8x32xf32> -> vector<8x32xf32>
    %c1_83 = arith.constant 1 : index
    %c0_84 = arith.constant 0 : index
    %c0_85 = arith.constant 0 : index
    %194 = vector.load %arg8[%c1_83, %c0_84, %c0_85] : memref<2x8x32xf32, #tpu.memory_space<vmem>>, vector<1x8x32xf32>
    %195 = vector.shape_cast %194 : vector<1x8x32xf32> to vector<8x32xf32>
    %196 = vector.shape_cast %193 : vector<8x32xf32> to vector<1x8x32xf32>
    tpu.vector_store %arg8[%c1_83, %c0_84, %c0_85], %196 {strides = array<i32>} : memref<2x8x32xf32, #tpu.memory_space<vmem>>, vector<1x8x32xf32>,
    return
  }
  func.func @transform_0(%arg0: i32, %arg1: i32) -> (i32, i32, i32) {
    %c0_i32 = arith.constant 0 : i32
    %c0_i32_0 = arith.constant 0 : i32
    %c0_i32_1 = arith.constant 0 : i32
    return %arg0, %c0_i32, %c0_i32_0 : i32, i32, i32
  }
  func.func @transform_1(%arg0: i32, %arg1: i32) -> (i32, i32, i32) {
    %c0_i32 = arith.constant 0 : i32
    %c0_i32_0 = arith.constant 0 : i32
    %c0_i32_1 = arith.constant 0 : i32
    return %arg0, %c0_i32, %c0_i32_0 : i32, i32, i32
  }
  func.func @transform_2(%arg0: i32, %arg1: i32) -> (i32, i32) {
    %c0_i32 = arith.constant 0 : i32
    %c0_i32_0 = arith.constant 0 : i32
    %c0_i32_1 = arith.constant 0 : i32
    return %c0_i32, %c0_i32_0 : i32, i32
  }
  func.func @transform_3(%arg0: i32, %arg1: i32) -> (i32, i32) {
    %c0_i32 = arith.constant 0 : i32
    %c0_i32_0 = arith.constant 0 : i32
    %c0_i32_1 = arith.constant 0 : i32
    return %c0_i32, %c0_i32_0 : i32, i32
  }
  func.func @transform_4(%arg0: i32, %arg1: i32) -> (i32, i32) {
    %c0_i32 = arith.constant 0 : i32
    %c0_i32_0 = arith.constant 0 : i32
    %c0_i32_1 = arith.constant 0 : i32
    return %c0_i32, %c0_i32_0 : i32, i32
  }
  func.func @transform_5(%arg0: i32, %arg1: i32) -> (i32, i32) {
    %c0_i32 = arith.constant 0 : i32
    %c0_i32_0 = arith.constant 0 : i32
    %c0_i32_1 = arith.constant 0 : i32
    return %c0_i32, %c0_i32_0 : i32, i32
  }
  func.func @transform_6(%arg0: i32, %arg1: i32) -> (i32, i32, i32) {
    %c0_i32 = arith.constant 0 : i32
    %c0_i32_0 = arith.constant 0 : i32
    return %arg0, %arg1, %c0_i32 : i32, i32, i32
  }
}

</mosaic_0001>

<bundles_post_ra>
// kernel: tpu_custom_call.1
= control target key start
LH: loop header
LB: loop body
LE: loop exit
PB: predicated region body
PF: predicated region fallthrough
CT: control target
= control target key end

     0   :  { %11 = vsyncpa [#allocation5], 0  ;;  %s1388_s0 = inlined_call_operand.hbm [shape: bf16[2,8,32], index: 0, kind: input, shape index: {}]   ;;  %s1389_s1 = inlined_call_operand.hbm [shape: f32[2,1,8], index: 1, kind: input, shape index: {}]   ;;  %s1390_s2 = inlined_call_operand.hbm [shape: bf16[32,32], index: 2, kind: input, shape index: {}]   ;;  %s1391_s3 = inlined_call_operand.hbm [shape: bf16[32,32], index: 3, kind: input, shape index: {}]   ;;  %s1392_s4 = inlined_call_operand.hbm [shape: bf16[32,32], index: 4, kind: input, shape index: {}]   ;;  %s1393_s5 = inlined_call_operand.hbm [shape: bf16[32,32], index: 5, kind: input, shape index: {}]   ;;  %s1394_s6 = inlined_call_operand.hbm [shape: f32[2,8,32], index: 6, kind: output, shape index: {}]  }
   0x1   :  { %12 = vsyncpa [#allocation8], 0 }
   0x2   :  { %13 = vsyncpa [#allocation11], 0 }
   0x3   :  { %14 = vsyncpa [#allocation14], 0  ;;  %s33_s23 = sshll.u32 %s1389_s1, 4  ;;  %s34_s23 = int_to_ptr.hbm [resolvable:$true] %s33_s23 }
   0x4   :  { %15 = vsyncpa [#allocation6], 0  ;;  %s1199_s24 = smov [#allocation7]   ;;  %s1200_s26 = smov 16  }
   0x5   :  { %s35_s25 = sshll.u32 %s1199_s24, 4  ;;  %s1201_s27 = smov 1   ;;  %s36_s25 = int_to_ptr.vmem [resolvable:$true] %s35_s25 }
   0x6   :  { %41 = dma.hbm_to_vmem [thread:$0]  %s34_s23, 32, %s36_s25, [#allocation8], %s1200_s26, %s1200_s26, %s1201_s27  }
   0x7   :  { %s59_s30 = sshll.u32 %s1391_s3, 4  ;;  %s1202_s7 = smov [#allocation10]   ;;  %s60_s30 = int_to_ptr.hbm [resolvable:$true] %s59_s30 }
   0x8   :  { %s61_s8 = sshll.u32 %s1202_s7, 4  ;;  %s20_s1 = sshll.u32 %s1388_s0, 4  ;;  %s62_s8 = int_to_ptr.vmem [resolvable:$true] %s61_s8  ;;  %s21_s1 = int_to_ptr.hbm [resolvable:$true] %s20_s1 }
   0x9   :  { %s1203_s11 = smov 64   ;;  %s1204_s12 = smov 4  }
   0xa   :  { %67 = dma.hbm_to_vmem [thread:$0]  %s60_s30, 256, %s62_s8, [#allocation11], %s1203_s11, %s1203_s11, %s1204_s12  }
   0xb   :  { %s46_s15 = sshll.u32 %s1390_s2, 4  ;;  %s1205_s16 = smov [#allocation4]   ;;  %s47_s15 = int_to_ptr.hbm [resolvable:$true] %s46_s15 }
   0xc   :  { %s22_s17 = sshll.u32 %s1205_s16, 4  ;;  %s1206_s3 = smov [#allocation9]   ;;  %s23_s17 = int_to_ptr.vmem [resolvable:$true] %s22_s17 }
   0xd   :  { %28 = dma.hbm_to_vmem [thread:$0]  %s21_s1, 128, %s23_s17, [#allocation5], %s1203_s11, %s1203_s11, %s1204_s12  }
   0xe   :  { %s48_s18 = sshll.u32 %s1206_s3, 4  ;;  %s72_s0 = sshll.u32 %s1392_s4, 4  ;;  %s49_s18 = int_to_ptr.vmem [resolvable:$true] %s48_s18  ;;  %s73_s0 = int_to_ptr.hbm [resolvable:$true] %s72_s0 }
   0xf   :  { %54 = dma.hbm_to_vmem [thread:$0]  %s47_s15, 256, %s49_s18, [#allocation8], %s1203_s11, %s1203_s11, %s1204_s12  }
  0x10   :  { %s85_s23 = sshll.u32 %s1393_s5, 4  ;;  %s1207_s24 = smov [#allocation12]   ;;  %s86_s23 = int_to_ptr.hbm [resolvable:$true] %s85_s23 }
  0x11   :  { %s74_s2 = sshll.u32 %s1207_s24, 4  ;;  %s1208_s25 = smov [#allocation13]   ;;  %s75_s2 = int_to_ptr.vmem [resolvable:$true] %s74_s2 }
  0x12   :  { %80 = dma.hbm_to_vmem [thread:$0]  %s73_s0, 256, %s75_s2, [#allocation11], %s1203_s11, %s1203_s11, %s1204_s12  }
  0x13   :  { %s87_s27 = sshll.u32 %s1208_s25, 4  ;;  %s88_s27 = int_to_ptr.vmem [resolvable:$true] %s87_s27 }
  0x14   :  { %93 = dma.hbm_to_vmem [thread:$0]  %s86_s23, 256, %s88_s27, [#allocation14], %s1203_s11, %s1203_s11, %s1204_s12  }
  0x15   :  { %1189 = dma.done.wait [#allocation5], 128  }
  0x16   :  { %1190 = vsyncadd [#allocation5], 4294967168 }
  0x17   :  { %1191 = dma.done.wait [#allocation8], 288  }
  0x18   :  { %1192 = vsyncadd [#allocation8], 4294967008 }
  0x19   :  { %1193 = dma.done.wait [#allocation11], 512  }
  0x1a   :  { %1194 = vsyncadd [#allocation11], 4294966784 }
  0x1b   :  { %1195 = dma.done.wait [#allocation14], 256  }
  0x1c   :  { %1196 = vsyncadd [#allocation14], 4294967040  ;;  %v962_v0 = vld [vmem:[#allocation10 + $0x8] sm:$0xff]  ;;  %v967_v1 = vld [vmem:[#allocation9 + $0x8] sm:$0xff]  ;;  %vm146_vm0 = vcmask 261120   ;;  %vm166_vm1 = vcmask 257024  }
  0x1d   :  { %156 = vmatpush.bf16.msra.mxu0 %v962_v0  ;;  %v961_v2 = vld [vmem:[#allocation10] sm:$0xff]  ;;  %v964_v3 = vld [vmem:[#allocation12 + $0x8] sm:$0xff]  ;;  %241 = vmatpush.bf16.msra.mxu2 %v967_v1  ;;  %v966_v4 = vld [vmem:[#allocation9] sm:$0xff]  ;;  %vm259_vm2 = vcmask 64512   ;;  %s1209_s4 = smov 104   ;;  %s1210_s5 = smov 120  }
  0x1e   :  { %191 = vmatpush.bf16.msra.mxu1 %v964_v3  ;;  %v963_v5 = vld [vmem:[#allocation12] sm:$0xff]  ;;  %v960_v6 = vld [vmem:[#allocation4] sm:$0xff]  ;;  %s1211_s28 = smov 112   ;;  %v251_v30 = vld [vmem:[#allocation7] sm:$0x1]  ;;  %vm295_vm3 = vcmask 1043456  }
  0x1f   :  { %v965_v7 = vld [vmem:[#allocation4] sm:$0xff]  ;;  %v252_v34 = vsub.f32 1.0, %v251_v30  ;;  %s1212_s29 = smov 8   ;;  %s1213_s30 = smov 24   ;;  %vm522_vm4 = vcmask 130048   ;;  %vm525_vm5 = vcmask 195584  }
  0x20   :  { %s873_s10 = sshll.u32 %s1394_s6, 4  ;;  %s1215_s1 = smov 128   ;;  %s874_s10 = int_to_ptr.hbm [resolvable:$true] %s873_s10 }
  0x21   :  { %157 = vmatpush.bf16.msra.mxu0 %v961_v2  ;;  %242 = vmatpush.bf16.msra.mxu2 %v966_v4  ;;  %v253_v35 = vmul.f32 -1e+12, %v252_v34 }
  0x22   :  { %192 = vmatpush.bf16.msra.mxu1 %v963_v5 }
  0x23   :  { %v257_v37 = vperm.slane %v253_v35, 0 }
  0x24   :  { %903 = vmatmul.msk.bf16.vlgmr.msra.gmra.mxu0 %vm146_vm0, %v960_v6  ;;  %925 = vmatmul.msk.bf16.vlgmr.msra.gmra.mxu2 %vm146_vm0, %v965_v7 }
  0x25   :  { %912 = vmatmul.msk.bf16.vlgmr.msra.gmra.mxu1 %vm146_vm0, %v960_v6 }
  0xa1   :  { %v159_v8 = vpop.f32.mrf.mxu0 }
  0xa2   :  { %v164_v9 = vpack.c.bf16 %v159_v8, %v159_v8  ;;  %v194_v10 = vpop.f32.mrf.mxu1 }
  0xa3   :  { %v199_v11 = vpack.c.bf16 %v194_v10, %v194_v10 }
  0xa4   :  { %167 = vst.msk [vmem:[#allocation2] sm:$0xf] %vm166_vm1, %v164_v9 }
  0xa5   :  { %201 = vst.msk [vmem:[#allocation3] sm:$0xf] %vm166_vm1, %v199_v11 }
  0xa7   :  { %v244_v12 = vpop.f32.mrf.mxu2 }
  0xa8   :  { %v249_v14 = vpack.c.bf16 %v244_v12, %v244_v12 }
  0xa9   :  { %v161_v13 = vpop.f32.mrf.mxu0 }
  0xaa   :  { %v165_v15 = vpack.c.bf16 %v161_v13, %v161_v13  ;;  %v316_v17 = vunpack.c.l.b16 %v249_v14  ;;  %v196_v41 = vpop.f32.mrf.mxu1 }
  0xab   :  { %v254_v16 = vld [vmem:[#allocation2] sm:$0xf]  ;;  %v200_v42 = vpack.c.bf16 %v196_v41, %v196_v41 }
  0xac   :  { %168 = vst.msk [vmem:[#allocation2 + $0x4] sm:$0xf] %vm166_vm1, %v165_v15  ;;  %v264_v18 = vsel %vm259_vm2, %v254_v16, 0  ;;  %v321_v19 = vunpack.c.l.b16 %v254_v16  ;;  %v317_v20 = vpack.c.b16 %v316_v17, %v316_v17  ;;  %v255_v22 = vld [vmem:[#allocation3] sm:$0xf] }
  0xad   :  { %273 = vmatpush.bf16.xpose.msra.mxu3 %v264_v18  ;;  %v358_v23 = vunpack.c.l.b16 %v255_v22  ;;  %v297_v43 = vsel %vm295_vm3, %v255_v22, 0  ;;  %202 = vst.msk [vmem:[#allocation3 + $0x4] sm:$0xf] %vm166_vm1, %v200_v42 }
  0xae   :  { %v322_v21 = vpack.c.b16 %v321_v19, %v321_v19  ;;  %444 = vrot.lane.b32.xlu2 %v317_v20, %s1209_s4  ;;  %306 = vmatpush.bf16.msrb.mxu0 %v297_v43 }
  0xaf   :  { %v1285_v24 = vpack.c.b16 %v358_v23, %v358_v23  ;;  %v246_v46 = vpop.f32.mrf.mxu2 }
  0xb0   :  { %446 = vrot.lane.b32.xlu1 %v322_v21, %s1209_s4  ;;  %323 = vrot.lane.b32.xlu0 %v322_v21, %s1210_s5  ;;  %v1304_v48 = vpack.c.bf16 %v246_v46, %v246_v46 }
  0xb2   :  { %v624_v49 = vunpack.c.l.b16 %v1304_v48 }
  0xb3   :  { %v1307_v51 = vld [vmem:[#allocation2 + $0x4] sm:$0xf] }
  0xb4   :  { %926 = vmatmul.msk.bf16.vlgmr.msra.gmra.mxu3 %vm259_vm2, %v249_v14  ;;  %v1300_v45 = vld [vmem:[#allocation3 + $0x4] sm:$0xf]  ;;  %v625_v50 = vpack.c.b16 %v624_v49, %v624_v49  ;;  %v629_v52 = vunpack.c.l.b16 %v1307_v51 }
  0xb5   :  { %v605_v47 = vsel %vm295_vm3, %v1300_v45, 0 }
  0xb6   :  { %384 = vrot.lane.b32.xlu2 %v317_v20, %s1211_s28  ;;  %v630_v53 = vpack.c.b16 %v629_v52, %v629_v52 }
  0xb8   :  { %386 = vrot.lane.b32.xlu1 %v322_v21, %s1211_s28  ;;  %318 = vrot.lane.b32.xlu0 %v317_v20, %s1210_s5 }
  0xbe   :  { %360 = vrot.lane.b32.xlu2 %v1285_v24, %s1210_s5 }
  0xc0   :  { %480 = vrot.lane.b32.xlu1 %v1285_v24, %s1209_s4 }
 0x108   :  { %v445_v29 = vpop.permute.xlu2 %444 }
 0x110   :  { %v385_v36 = vpop.permute.xlu2 %384 }
 0x118   :  { %v361_v6 = vpop.permute.xlu2 %360 }
 0x119   :  { %v366_v11 = vsel %vm295_vm3, %v361_v6, 0  ;;  %v666_v6 = vunpack.c.l.b16 %v1300_v45 }
 0x11a   :  { %375 = vmatpush.bf16.msrb.mxu2 %v366_v11 }
 0x122   :  { %v447_v25 = vpop.permute.xlu1 %446  ;;  %v324_v26 = vpop.permute.xlu0 %323 }
 0x123   :  { %v452_v27 = vsel %vm259_vm2, %v447_v25, 0  ;;  %v329_v28 = vsel %vm259_vm2, %v324_v26, 0 }
 0x124   :  { %338 = vmatpush.bf16.xpose.msrb.mxu1 %v329_v28 }
 0x12a   :  { %v387_v31 = vpop.permute.xlu1 %386  ;;  %v319_v32 = vpop.permute.xlu0 %318 }
 0x12b   :  { %928 = vmatmul.msk.bf16.vlgmr.msrb.gmra.mxu1 %vm259_vm2, %v319_v32  ;;  %v392_v33 = vsel %vm259_vm2, %v387_v31, 0 }
 0x12c   :  { %461 = vmatpush.bf16.xpose.msra.mxu1 %v452_v27  ;;  %401 = vmatpush.bf16.xpose.msrb.mxu3 %v392_v33 }
 0x132   :  { %v481_v54 = vpop.permute.xlu1 %480 }
 0x133   :  { %930 = vmatmul.msk.bf16.vlgmr.msrb.gmra.mxu3 %vm259_vm2, %v385_v36  ;;  %v486_v8 = vsel %vm295_vm3, %v481_v54, 0  ;;  %v573_v36 = vsel %vm259_vm2, %v1307_v51, 0 }
 0x134   :  { %614 = vmatpush.bf16.msrb.mxu1 %v605_v47  ;;  %495 = vmatpush.bf16.msra.mxu2 %v486_v8  ;;  %v667_v8 = vpack.c.b16 %v666_v6, %v666_v6 }
 0x137   :  { %v275_v38 = vpop.f32.mrf.mxu3 }
 0x138   :  { %v276_v39 = vadd.f32 %v275_v38, %v257_v37 }
 0x13a   :  { %v279_v40 = vsel %vm259_vm2, %v276_v39, -inf }
 0x13b   :  { %932 = vmatmul.msk.bf16.vlgmr.msra.gmra.mxu1 %vm259_vm2, %v445_v29  ;;  %280 = vmax.xlane.f32.xlu1 %v279_v40 }
 0x13f   :  { %v277_v44 = vpop.f32.mrf.mxu3 }
 0x154   :  { %626 = vrot.lane.b32.xlu1 %v625_v50, %s1210_s5 }
 0x15c   :  { %694 = vrot.lane.b32.xlu1 %v630_v53, %s1211_s28 }
 0x1a8   :  { %v340_v55 = vpop.f32.mrf.mxu1 }
 0x1a9   :  { %v341_v56 = vadd.f32 %v340_v55, %v257_v37 }
 0x1ab   :  { %v344_v57 = vsel %vm259_vm2, %v341_v56, -inf }
 0x1ac   :  { %345 = vmax.xlane.f32.xlu0 %v344_v57 }
 0x1ae   :  { %v281_v58 = vpop.xlane.xlu1 %280 }
 0x1af   :  { %v282_v59 = vsub.f32 %v276_v39, %v281_v58 }
 0x1b0   :  { %v342_v60 = vpop.f32.mrf.mxu1 }
 0x1b1   :  { %v283_v61 = vpack.c.bf16 %v282_v59, %v282_v59 }
 0x1b3   :  { %v284_v62 = vunpack.c.l.bf16 %v283_v61 }
 0x1b5   :  { %v285_v63 = vmul.f32 1.442695, %v284_v62 }
 0x1b6   :  { %v403_v0 = vpop.f32.mrf.mxu3 }
 0x1b7   :  { %989 = vpow2.f32 %v285_v63  ;;  %v404_v1 = vadd.f32 %v403_v0, %v257_v37 }
 0x1b8   :  { %v463_v2 = vpop.f32.mrf.mxu1 }
 0x1b9   :  { %v464_v3 = vadd.f32 %v463_v2, %v257_v37  ;;  %v407_v4 = vsel %vm259_vm2, %v404_v1, -inf }
 0x1ba   :  { %408 = vmax.xlane.f32.xlu0 %v407_v4 }
 0x1bb   :  { %v467_v5 = vsel %vm259_vm2, %v464_v3, -inf }
 0x1bc   :  { %468 = vmax.xlane.f32.xlu2 %v467_v5 }
 0x1bd   :  { %v990_v7 = vpop.eup %989 }
 0x1be   :  { %v287_v9 = vpack.c.bf16 %v990_v7, %v990_v7  ;;  %v405_v10 = vpop.f32.mrf.mxu3 }
 0x1c0   :  { %927 = vmatmul.msk.bf16.vlgmr.msrb.gmra.mxu0 %vm259_vm2, %v287_v9  ;;  %v465_v12 = vpop.f32.mrf.mxu1  ;;  %v288_v34 = vunpack.c.l.bf16 %v287_v9 }
 0x1c1   :  { %v561_v12 = vld [vmem:[#allocation7 + $0x1] sm:$0x1] }
 0x1c2   :  { %v289_v37 = vsel %vm259_vm2, %v288_v34, 0.0 }
 0x1c6   :  { %v627_v26 = vpop.permute.xlu1 %626 }
 0x1ce   :  { %631 = vrot.lane.b32.xlu0 %v630_v53, %s1210_s5  ;;  %v695_v39 = vpop.permute.xlu1 %694 }
 0x1cf   :  { %v700_v43 = vsel %vm259_vm2, %v695_v39, 0 }
 0x1d4   :  { %420 = vrot.lane.b32.xlu2 %v1285_v24, %s1211_s28 }
 0x1d6   :  { %754 = vrot.lane.b32.xlu0 %v630_v53, %s1209_s4 }
 0x1dc   :  { %752 = vrot.lane.b32.xlu2 %v625_v50, %s1209_s4 }
 0x1de   :  { %692 = vrot.lane.b32.xlu0 %v625_v50, %s1211_s28 }
 0x21f   :  { %v346_v13 = vpop.xlane.xlu0 %345 }
 0x220   :  { %v347_v14 = vsub.f32 %v341_v56, %v346_v13  ;;  %v562_v13 = vsub.f32 1.0, %v561_v12 }
 0x222   :  { %v348_v15 = vpack.c.bf16 %v347_v14, %v347_v14 }
 0x224   :  { %v349_v16 = vunpack.c.l.bf16 %v348_v15 }
 0x226   :  { %v350_v17 = vmul.f32 1.442695, %v349_v16  ;;  %v563_v16 = vmul.f32 -1e+12, %v562_v13 }
 0x228   :  { %991 = vpow2.f32 %v350_v17  ;;  %v567_v17 = vperm.slane %v563_v16, 0 }
 0x22d   :  { %v409_v18 = vpop.xlane.xlu0 %408 }
 0x22e   :  { %v992_v19 = vpop.eup %991  ;;  %v410_v20 = vsub.f32 %v404_v1, %v409_v18 }
 0x22f   :  { %v352_v21 = vpack.c.bf16 %v992_v19, %v992_v19  ;;  %v469_v22 = vpop.xlane.xlu2 %468 }
 0x230   :  { %v411_v23 = vpack.c.bf16 %v410_v20, %v410_v20  ;;  %v470_v25 = vsub.f32 %v464_v3, %v469_v22 }
 0x231   :  { %929 = vmatmul.msk.bf16.vlgmr.msrb.gmra.mxu2 %vm259_vm2, %v352_v21  ;;  %v353_v24 = vunpack.c.l.bf16 %v352_v21 }
 0x232   :  { %v412_v27 = vunpack.c.l.bf16 %v411_v23  ;;  %v471_v28 = vpack.c.bf16 %v470_v25, %v470_v25 }
 0x233   :  { %v354_v29 = vsel %vm259_vm2, %v353_v24, 0.0 }
 0x234   :  { %v413_v30 = vmul.f32 1.442695, %v412_v27  ;;  %v472_v31 = vunpack.c.l.bf16 %v471_v28  ;;  %355 = vadd.xlane.f32.xlu2 %v354_v29 }
 0x236   :  { %993 = vpow2.f32 %v413_v30  ;;  %v473_v32 = vmul.f32 1.442695, %v472_v31 }
 0x237   :  { %v421_v33 = vpop.permute.xlu2 %420 }
 0x238   :  { %995 = vpow2.f32 %v473_v32  ;;  %v426_v35 = vsel %vm295_vm3, %v421_v33, 0 }
 0x239   :  { %435 = vmatpush.bf16.msra.mxu0 %v426_v35 }
 0x23c   :  { %v994_v38 = vpop.eup %993  ;;  %290 = vadd.xlane.f32.xlu2 %v289_v37 }
 0x23d   :  { %582 = vmatpush.bf16.xpose.msrb.mxu0 %v573_v36  ;;  %v415_v40 = vpack.c.bf16 %v994_v38, %v994_v38  ;;  %v1330_v41 = vpop.f32.mrf.mxu0  ;;  %v969_v36 = vld [vmem:[#allocation13 + $0x8] sm:$0xff]  ;;  %v968_v38 = vld [vmem:[#allocation13] sm:$0xff] }
 0x23e   :  { %v996_v42 = vpop.eup %995  ;;  %552 = vmatpush.bf16.msra.mxu3 %v969_v36 }
 0x23f   :  { %v475_v44 = vpack.c.bf16 %v996_v42, %v996_v42  ;;  %931 = vmatmul.msk.bf16.vlgmr.msra.gmra.mxu0 %vm259_vm2, %v415_v40  ;;  %v416_v46 = vunpack.c.l.bf16 %v415_v40  ;;  %v753_v57 = vpop.permute.xlu2 %752 }
 0x240   :  { %v632_v47 = vpop.permute.xlu0 %631 }
 0x241   :  { %v637_v49 = vsel %vm259_vm2, %v632_v47, 0  ;;  %933 = vmatmul.msk.bf16.vlgmr.msra.gmra.mxu2 %vm259_vm2, %v475_v44  ;;  %v417_v50 = vsel %vm259_vm2, %v416_v46, 0.0  ;;  %v476_v51 = vunpack.c.l.bf16 %v475_v44 }
 0x242   :  { %418 = vadd.xlane.f32.xlu1 %v417_v50  ;;  %646 = vmatpush.bf16.xpose.msrb.mxu2 %v637_v49 }
 0x243   :  { %v477_v52 = vsel %vm259_vm2, %v476_v51, 0.0  ;;  %553 = vmatpush.bf16.msra.mxu3 %v968_v38 }
 0x244   :  { %478 = vadd.xlane.f32.xlu0 %v477_v52 }
 0x245   :  { %709 = vmatpush.bf16.xpose.msra.mxu0 %v700_v43  ;;  %v310_v53 = vpop.f32.mrf.mxu0 }
 0x248   :  { %v755_v54 = vpop.permute.xlu0 %754 }
 0x249   :  { %v760_v55 = vsel %vm259_vm2, %v755_v54, 0 }
 0x24a   :  { %769 = vmatpush.bf16.xpose.msra.mxu2 %v760_v55 }
 0x24f   :  { %943 = vmatmul.msk.bf16.vlgmr.msrb.gmra.mxu0 %vm259_vm2, %v1304_v48 }
 0x250   :  { %v693_v56 = vpop.permute.xlu0 %692 }
 0x251   :  { %945 = vmatmul.msk.bf16.vlgmr.msrb.gmra.mxu2 %vm259_vm2, %v627_v26 }
 0x25f   :  { %947 = vmatmul.msk.bf16.vlgmr.msra.gmra.mxu0 %vm259_vm2, %v693_v56 }
 0x261   :  { %949 = vmatmul.msk.bf16.vlgmr.msra.gmra.mxu2 %vm259_vm2, %v753_v57 }
 0x2a7   :  { %v356_v58 = vpop.xlane.xlu2 %355 }
 0x2a8   :  { %997 = vrcp.f32 %v356_v58 }
 0x2ae   :  { %v998_v59 = vpop.eup %997 }
 0x2af   :  { %v291_v44 = vpop.xlane.xlu2 %290 }
 0x2b4   :  { %v377_v60 = vpop.f32.mrf.mxu2 }
 0x2b5   :  { %v382_v61 = vmul.f32 %v998_v59, %v377_v60  ;;  %v419_v62 = vpop.xlane.xlu1 %418 }
 0x2b6   :  { %999 = vrcp.f32 %v419_v62 }
 0x2b7   :  { %v383_v63 = vpack.c.bf16 %v382_v61, %v382_v61  ;;  %v479_v21 = vpop.xlane.xlu0 %478 }
 0x2b8   :  { %1001 = vrcp.f32 %v479_v21 }
 0x2b9   :  { %v505_v0 = vunpack.c.l.b16 %v383_v63  ;;  %1003 = vrcp.f32 %v291_v44 }
 0x2bb   :  { %v506_v1 = vpack.c.b16 %v505_v0, %v505_v0 }
 0x2bc   :  { %v1000_v2 = vpop.eup %999  ;;  %v379_v48 = vpop.f32.mrf.mxu2 }
 0x2bd   :  { %v437_v3 = vpop.f32.mrf.mxu0  ;;  %507 = vrot.lane.b32.xlu1 %v506_v1, %s1212_s29 }
 0x2be   :  { %v442_v4 = vmul.f32 %v1000_v2, %v437_v3  ;;  %v1002_v25 = vpop.eup %1001 }
 0x2bf   :  { %v1004_v46 = vpop.eup %1003 }
 0x2c0   :  { %v443_v5 = vpack.c.bf16 %v442_v4, %v442_v4  ;;  %v313_v49 = vmul.f32 %v1004_v46, %v1330_v41 }
 0x2c2   :  { %v510_v7 = vunpack.c.l.b16 %v443_v5  ;;  %v314_v52 = vpack.c.bf16 %v313_v49, %v313_v49 }
 0x2c4   :  { %v511_v9 = vpack.c.b16 %v510_v7, %v510_v7  ;;  %v497_v11 = vpop.f32.mrf.mxu2 }
 0x2c5   :  { %v439_v10 = vpop.f32.mrf.mxu0  ;;  %668 = vrot.lane.b32.xlu1 %v667_v8, %s1210_s5  ;;  %v502_v24 = vmul.f32 %v1002_v25, %v497_v11 }
 0x2c6   :  { %512 = vrot.lane.b32.xlu0 %v511_v9, %s1200_s26 }
 0x2c7   :  { %v503_v28 = vpack.c.bf16 %v502_v24, %v502_v24 }
 0x2c9   :  { %v515_v29 = vunpack.c.l.b16 %v503_v28 }
 0x2cb   :  { %v516_v33 = vpack.c.b16 %v515_v29, %v515_v29 }
 0x2cc   :  { %v499_v14 = vpop.f32.mrf.mxu2 }
 0x2cd   :  { %v584_v15 = vpop.f32.mrf.mxu0 }
 0x2ce   :  { %v585_v30 = vadd.f32 %v584_v15, %v567_v17 }
 0x2d0   :  { %v588_v35 = vsel %vm259_vm2, %v585_v30, -inf }
 0x2d4   :  { %v648_v19 = vpop.f32.mrf.mxu2 }
 0x2d5   :  { %v586_v18 = vpop.f32.mrf.mxu0  ;;  %v649_v20 = vadd.f32 %v648_v19, %v567_v17 }
 0x2d7   :  { %v652_v45 = vsel %vm259_vm2, %v649_v20, -inf }
 0x2d8   :  { %653 = vmax.xlane.f32.xlu2 %v652_v45 }
 0x2dc   :  { %v650_v22 = vpop.f32.mrf.mxu2 }
 0x2dd   :  { %v711_v23 = vpop.f32.mrf.mxu0 }
 0x2de   :  { %v1354_v37 = vadd.f32 %v711_v23, %v567_v17 }
 0x2e0   :  { %v715_v39 = vsel %vm259_vm2, %v1354_v37, -inf }
 0x2e4   :  { %v771_v27 = vpop.f32.mrf.mxu2 }
 0x2e5   :  { %v713_v26 = vpop.f32.mrf.mxu0  ;;  %v772_v31 = vadd.f32 %v771_v27, %v567_v17 }
 0x2e7   :  { %v775_v34 = vsel %vm259_vm2, %v772_v31, -inf }
 0x2ec   :  { %v773_v32 = vpop.f32.mrf.mxu2 }
 0x2ef   :  { %776 = vmax.xlane.f32.xlu1 %v775_v34 }
 0x2f0   :  { %589 = vmax.xlane.f32.xlu0 %v588_v35  ;;  %517 = vrot.lane.b32.xlu2 %v516_v33, %s1213_s30 }
 0x304   :  { %788 = vrot.lane.b32.xlu0 %v667_v8, %s1209_s4 }
 0x308   :  { %728 = vrot.lane.b32.xlu1 %v667_v8, %s1211_s28 }
 0x319   :  { %716 = vmax.xlane.f32.xlu2 %v715_v39 }
 0x32f   :  { %v508_v40 = vpop.permute.xlu1 %507 }
 0x330   :  { %v521_v55 = vsel %vm259_vm2, %v314_v52, %v508_v40 }
 0x337   :  { %v669_v42 = vpop.permute.xlu1 %668 }
 0x338   :  { %v674_v43 = vsel %vm295_vm3, %v669_v42, 0  ;;  %v513_v53 = vpop.permute.xlu0 %512 }
 0x339   :  { %683 = vmatpush.bf16.msrb.mxu3 %v674_v43  ;;  %v524_v57 = vsel %vm522_vm4, %v521_v55, %v513_v53 }
 0x34b   :  { %v654_v47 = vpop.xlane.xlu2 %653 }
 0x34c   :  { %v655_v50 = vsub.f32 %v649_v20, %v654_v47 }
 0x34e   :  { %v656_v51 = vpack.c.bf16 %v655_v50, %v655_v50 }
 0x350   :  { %v657_v54 = vunpack.c.l.bf16 %v656_v51 }
 0x352   :  { %v658_v56 = vmul.f32 1.442695, %v657_v54 }
 0x353   :  { %v518_v58 = vpop.permute.xlu2 %517 }
 0x354   :  { %1005 = vpow2.f32 %v658_v56  ;;  %v527_v59 = vsel %vm525_vm5, %v524_v57, %v518_v58 }
 0x355   :  { %942 = vmatmul.msk.bf16.vlgmr.msra.gmra.mxu3 %vm146_vm0, %v527_v59  ;;  %v971_v59 = vld [vmem:[#allocation13 + $0x8] sm:$0xff] }
 0x356   :  { %858 = vmatpush.bf16.msrb.mxu0 %v971_v59 }
 0x35a   :  { %v1006_v60 = vpop.eup %1005 }
 0x35b   :  { %v660_v41 = vpack.c.bf16 %v1006_v60, %v1006_v60  ;;  %v970_v60 = vld [vmem:[#allocation13] sm:$0xff] }
 0x35c   :  { %859 = vmatpush.bf16.msrb.mxu0 %v970_v60 }
 0x35d   :  { %v661_v61 = vunpack.c.l.bf16 %v660_v41 }
 0x35f   :  { %v662_v62 = vsel %vm259_vm2, %v661_v61, 0.0 }
 0x360   :  { %663 = vadd.xlane.f32.xlu2 %v662_v62 }
 0x362   :  { %v777_v63 = vpop.xlane.xlu1 %776 }
 0x363   :  { %v590_v0 = vpop.xlane.xlu0 %589  ;;  %v778_v1 = vsub.f32 %v772_v31, %v777_v63 }
 0x364   :  { %v591_v2 = vsub.f32 %v585_v30, %v590_v0 }
 0x365   :  { %v779_v48 = vpack.c.bf16 %v778_v1, %v778_v1  ;;  %946 = vmatmul.msk.bf16.vlgmr.msrb.gmra.mxu3 %vm259_vm2, %v660_v41 }
 0x366   :  { %v592_v3 = vpack.c.bf16 %v591_v2, %v591_v2 }
 0x367   :  { %v780_v4 = vunpack.c.l.bf16 %v779_v48 }
 0x368   :  { %v593_v5 = vunpack.c.l.bf16 %v592_v3 }
 0x369   :  { %v781_v6 = vmul.f32 1.442695, %v780_v4 }
 0x36a   :  { %v594_v7 = vmul.f32 1.442695, %v593_v5 }
 0x36b   :  { %1007 = vpow2.f32 %v781_v6 }
 0x36c   :  { %1009 = vpow2.f32 %v594_v7 }
 0x371   :  { %v1008_v8 = vpop.eup %1007 }
 0x372   :  { %v1010_v9 = vpop.eup %1009  ;;  %v783_v10 = vpack.c.bf16 %v1008_v8, %v1008_v8 }
 0x373   :  { %v596_v11 = vpack.c.bf16 %v1010_v9, %v1010_v9 }
 0x374   :  { %v784_v12 = vunpack.c.l.bf16 %v783_v10 }
 0x375   :  { %944 = vmatmul.msk.bf16.vlgmr.msrb.gmra.mxu1 %vm259_vm2, %v596_v11  ;;  %v597_v17 = vunpack.c.l.bf16 %v596_v11 }
 0x376   :  { %v789_v13 = vpop.permute.xlu0 %788  ;;  %v785_v15 = vsel %vm259_vm2, %v784_v12, 0.0 }
 0x377   :  { %v794_v14 = vsel %vm295_vm3, %v789_v13, 0  ;;  %786 = vadd.xlane.f32.xlu2 %v785_v15  ;;  %v598_v19 = vsel %vm259_vm2, %v597_v17, 0.0 }
 0x378   :  { %803 = vmatpush.bf16.msra.mxu3 %v794_v14 }
 0x37a   :  { %v729_v16 = vpop.permute.xlu1 %728 }
 0x37b   :  { %950 = vmatmul.msk.bf16.vlgmr.msra.gmra.mxu3 %vm259_vm2, %v783_v10  ;;  %v734_v18 = vsel %vm295_vm3, %v729_v16, 0 }
 0x37c   :  { %743 = vmatpush.bf16.msra.mxu1 %v734_v18 }
 0x37f   :  { %599 = vadd.xlane.f32.xlu2 %v598_v19 }
 0x38c   :  { %v717_v20 = vpop.xlane.xlu2 %716 }
 0x38d   :  { %v718_v45 = vsub.f32 %v1354_v37, %v717_v20 }
 0x38f   :  { %v719_v21 = vpack.c.bf16 %v718_v45, %v718_v45 }
 0x391   :  { %v720_v22 = vunpack.c.l.bf16 %v719_v21 }
 0x393   :  { %v721_v23 = vmul.f32 1.442695, %v720_v22 }
 0x395   :  { %1011 = vpow2.f32 %v721_v23 }
 0x39b   :  { %v1012_v25 = vpop.eup %1011 }
 0x39c   :  { %v723_v24 = vpack.c.bf16 %v1012_v25, %v1012_v25 }
 0x39e   :  { %948 = vmatmul.msk.bf16.vlgmr.msra.gmra.mxu1 %vm259_vm2, %v723_v24  ;;  %v724_v26 = vunpack.c.l.bf16 %v723_v24 }
 0x3a0   :  { %v725_v27 = vsel %vm259_vm2, %v724_v26, 0.0 }
 0x3a1   :  { %726 = vadd.xlane.f32.xlu0 %v725_v27 }
 0x3d3   :  { %v664_v29 = vpop.xlane.xlu2 %663 }
 0x3d4   :  { %1013 = vrcp.f32 %v664_v29 }
 0x3d8   :  { %v555_v28 = vpop.f32.mrf.mxu3 }
 0x3d9   :  { %559 = vst.msk [vmem:[#allocation15] sm:$0xff] %vm146_vm0, %v555_v28 }
 0x3da   :  { %v1014_v31 = vpop.eup %1013 }
 0x3e0   :  { %v557_v30 = vpop.f32.mrf.mxu3 }
 0x3e8   :  { %v685_v32 = vpop.f32.mrf.mxu3 }
 0x3e9   :  { %v690_v33 = vmul.f32 %v1014_v31, %v685_v32 }
 0x3ea   :  { %v787_v39 = vpop.xlane.xlu2 %786 }
 0x3eb   :  { %v691_v34 = vpack.c.bf16 %v690_v33, %v690_v33  ;;  %1015 = vrcp.f32 %v787_v39 }
 0x3ed   :  { %v813_v35 = vunpack.c.l.b16 %v691_v34 }
 0x3ef   :  { %v814_v36 = vpack.c.b16 %v813_v35, %v813_v35 }
 0x3f0   :  { %v687_v37 = vpop.f32.mrf.mxu3 }
 0x3f1   :  { %815 = vrot.lane.b32.xlu1 %v814_v36, %s1212_s29  ;;  %v1016_v42 = vpop.eup %1015 }
 0x3f2   :  { %v616_v38 = vpop.f32.mrf.mxu1  ;;  %v600_v41 = vpop.xlane.xlu2 %599 }
 0x3fa   :  { %v618_v40 = vpop.f32.mrf.mxu1 }
 0x3fe   :  { %v805_v43 = vpop.f32.mrf.mxu3 }
 0x3ff   :  { %v810_v44 = vmul.f32 %v1016_v42, %v805_v43 }
 0x401   :  { %v811_v46 = vpack.c.bf16 %v810_v44, %v810_v44 }
 0x403   :  { %v823_v47 = vunpack.c.l.b16 %v811_v46 }
 0x405   :  { %v824_v49 = vpack.c.b16 %v823_v47, %v823_v47 }
 0x406   :  { %v807_v50 = vpop.f32.mrf.mxu3 }
 0x407   :  { %825 = vrot.lane.b32.xlu1 %v824_v49, %s1213_s30 }
 0x414   :  { %v727_v51 = vpop.xlane.xlu0 %726 }
 0x415   :  { %1017 = vrcp.f32 %v727_v51 }
 0x416   :  { %1019 = vrcp.f32 %v600_v41 }
 0x41b   :  { %v1018_v52 = vpop.eup %1017  ;;  %v745_v53 = vpop.f32.mrf.mxu1 }
 0x41c   :  { %v750_v54 = vmul.f32 %v1018_v52, %v745_v53  ;;  %v1020_v61 = vpop.eup %1019 }
 0x41d   :  { %v621_v63 = vmul.f32 %v1020_v61, %v616_v38 }
 0x41e   :  { %v751_v55 = vpack.c.bf16 %v750_v54, %v750_v54 }
 0x41f   :  { %v622_v0 = vpack.c.bf16 %v621_v63, %v621_v63 }
 0x420   :  { %v818_v56 = vunpack.c.l.b16 %v751_v55 }
 0x422   :  { %v819_v57 = vpack.c.b16 %v818_v56, %v818_v56 }
 0x423   :  { %v747_v58 = vpop.f32.mrf.mxu1 }
 0x424   :  { %820 = vrot.lane.b32.xlu2 %v819_v57, %s1200_s26  ;;  %s1214_s26 = smov [#allocation15]  }
 0x425   :  { %s871_s7 = sshll.u32 %s1214_s26, 4  ;;  %s872_s7 = int_to_ptr.vmem [resolvable:$true] %s871_s7 }
 0x463   :  { %v816_v62 = vpop.permute.xlu1 %815 }
 0x464   :  { %v829_v1 = vsel %vm259_vm2, %v622_v0, %v816_v62 }
 0x479   :  { %v826_v48 = vpop.permute.xlu1 %825 }
 0x47e   :  { %v821_v2 = vpop.permute.xlu2 %820 }
 0x47f   :  { %v831_v3 = vsel %vm522_vm4, %v829_v1, %v821_v2 }
 0x480   :  { %v833_v4 = vsel %vm525_vm5, %v831_v3, %v826_v48 }
 0x481   :  { %959 = vmatmul.msk.bf16.vlgmr.msrb.gmra.mxu0 %vm146_vm0, %v833_v4 }
 0x4fe   :  { %v861_v5 = vpop.f32.mrf.mxu0 }
 0x4ff   :  { %866 = vst.msk [vmem:[#allocation15 + $0x8] sm:$0xff] %vm146_vm0, %v861_v5 }
 0x500   :  { %879 = dma.vmem_to_hbm [thread:$0]  %s872_s7, 256, %s874_s10, [#allocation6], %s1215_s1, %s1215_s1, %s1212_s29  }
 0x506   :  { %v863_v6 = vpop.f32.mrf.mxu0 }
 0x507   :  { %1197 = dma.done.wait [#allocation6], 256  }
 0x508   :  { %1198 = vsyncadd [#allocation6], 4294967040 }
 0x509   :  { %884 = vsyncpa [#allocation5], 1 }
 0x50a   :  { %885 = vsyncpa [#allocation8], 1 }
 0x50b   :  { %886 = vsyncpa [#allocation11], 1 }
 0x50c   :  { %887 = vsyncpa [#allocation14], 1 }
 0x50d   :  { %888 = vsyncpa [#allocation6], 1 }

// kernel: tpu_custom_call.1
= control target key start
LH: loop header
LB: loop body
LE: loop exit
PB: predicated region body
PF: predicated region fallthrough
CT: control target
= control target key end

     0   :  { %11 = vsyncpa [#allocation5], 0  ;;  %s1388_s0 = inlined_call_operand.hbm [shape: bf16[2,8,32], index: 0, kind: input, shape index: {}]   ;;  %s1389_s1 = inlined_call_operand.hbm [shape: f32[2,1,8], index: 1, kind: input, shape index: {}]   ;;  %s1390_s2 = inlined_call_operand.hbm [shape: bf16[32,32], index: 2, kind: input, shape index: {}]   ;;  %s1391_s3 = inlined_call_operand.hbm [shape: bf16[32,32], index: 3, kind: input, shape index: {}]   ;;  %s1392_s4 = inlined_call_operand.hbm [shape: bf16[32,32], index: 4, kind: input, shape index: {}]   ;;  %s1393_s5 = inlined_call_operand.hbm [shape: bf16[32,32], index: 5, kind: input, shape index: {}]   ;;  %s1394_s6 = inlined_call_operand.hbm [shape: f32[2,8,32], index: 6, kind: output, shape index: {}]  }
   0x1   :  { %12 = vsyncpa [#allocation8], 0 }
   0x2   :  { %13 = vsyncpa [#allocation11], 0 }
   0x3   :  { %14 = vsyncpa [#allocation14], 0  ;;  %s33_s23 = sshll.u32 %s1389_s1, 4  ;;  %s34_s23 = int_to_ptr.hbm [resolvable:$true] %s33_s23 }
   0x4   :  { %15 = vsyncpa [#allocation6], 0  ;;  %s1199_s24 = smov [#allocation7]   ;;  %s1200_s26 = smov 16  }
   0x5   :  { %s35_s25 = sshll.u32 %s1199_s24, 4  ;;  %s1201_s27 = smov 1   ;;  %s36_s25 = int_to_ptr.vmem [resolvable:$true] %s35_s25 }
   0x6   :  { %41 = dma.hbm_to_vmem [thread:$0]  %s34_s23, 32, %s36_s25, [#allocation8], %s1200_s26, %s1200_s26, %s1201_s27  }
   0x7   :  { %s59_s30 = sshll.u32 %s1391_s3, 4  ;;  %s1202_s7 = smov [#allocation10]   ;;  %s60_s30 = int_to_ptr.hbm [resolvable:$true] %s59_s30 }
   0x8   :  { %s61_s8 = sshll.u32 %s1202_s7, 4  ;;  %s20_s1 = sshll.u32 %s1388_s0, 4  ;;  %s62_s8 = int_to_ptr.vmem [resolvable:$true] %s61_s8  ;;  %s21_s1 = int_to_ptr.hbm [resolvable:$true] %s20_s1 }
   0x9   :  { %s1203_s11 = smov 64   ;;  %s1204_s12 = smov 4  }
   0xa   :  { %67 = dma.hbm_to_vmem [thread:$0]  %s60_s30, 256, %s62_s8, [#allocation11], %s1203_s11, %s1203_s11, %s1204_s12  }
   0xb   :  { %s46_s15 = sshll.u32 %s1390_s2, 4  ;;  %s1205_s16 = smov [#allocation4]   ;;  %s47_s15 = int_to_ptr.hbm [resolvable:$true] %s46_s15 }
   0xc   :  { %s22_s17 = sshll.u32 %s1205_s16, 4  ;;  %s1206_s3 = smov [#allocation9]   ;;  %s23_s17 = int_to_ptr.vmem [resolvable:$true] %s22_s17 }
   0xd   :  { %28 = dma.hbm_to_vmem [thread:$0]  %s21_s1, 128, %s23_s17, [#allocation5], %s1203_s11, %s1203_s11, %s1204_s12  }
   0xe   :  { %s48_s18 = sshll.u32 %s1206_s3, 4  ;;  %s72_s0 = sshll.u32 %s1392_s4, 4  ;;  %s49_s18 = int_to_ptr.vmem [resolvable:$true] %s48_s18  ;;  %s73_s0 = int_to_ptr.hbm [resolvable:$true] %s72_s0 }
   0xf   :  { %54 = dma.hbm_to_vmem [thread:$0]  %s47_s15, 256, %s49_s18, [#allocation8], %s1203_s11, %s1203_s11, %s1204_s12  }
  0x10   :  { %s85_s23 = sshll.u32 %s1393_s5, 4  ;;  %s1207_s24 = smov [#allocation12]   ;;  %s86_s23 = int_to_ptr.hbm [resolvable:$true] %s85_s23 }
  0x11   :  { %s74_s2 = sshll.u32 %s1207_s24, 4  ;;  %s1208_s25 = smov [#allocation13]   ;;  %s75_s2 = int_to_ptr.vmem [resolvable:$true] %s74_s2 }
  0x12   :  { %80 = dma.hbm_to_vmem [thread:$0]  %s73_s0, 256, %s75_s2, [#allocation11], %s1203_s11, %s1203_s11, %s1204_s12  }
  0x13   :  { %s87_s27 = sshll.u32 %s1208_s25, 4  ;;  %s88_s27 = int_to_ptr.vmem [resolvable:$true] %s87_s27 }
  0x14   :  { %93 = dma.hbm_to_vmem [thread:$0]  %s86_s23, 256, %s88_s27, [#allocation14], %s1203_s11, %s1203_s11, %s1204_s12  }
  0x15   :  { %1189 = dma.done.wait [#allocation5], 128  }
  0x16   :  { %1190 = vsyncadd [#allocation5], 4294967168 }
  0x17   :  { %1191 = dma.done.wait [#allocation8], 288  }
  0x18   :  { %1192 = vsyncadd [#allocation8], 4294967008 }
  0x19   :  { %1193 = dma.done.wait [#allocation11], 512  }
  0x1a   :  { %1194 = vsyncadd [#allocation11], 4294966784 }
  0x1b   :  { %1195 = dma.done.wait [#allocation14], 256  }
  0x1c   :  { %1196 = vsyncadd [#allocation14], 4294967040  ;;  %v962_v0 = vld [vmem:[#allocation10 + $0x8] sm:$0xff]  ;;  %v967_v1 = vld [vmem:[#allocation9 + $0x8] sm:$0xff]  ;;  %vm146_vm0 = vcmask 261120   ;;  %vm166_vm1 = vcmask 257024  }
  0x1d   :  { %156 = vmatpush.bf16.msra.mxu0 %v962_v0  ;;  %v961_v2 = vld [vmem:[#allocation10] sm:$0xff]  ;;  %v964_v3 = vld [vmem:[#allocation12 + $0x8] sm:$0xff]  ;;  %241 = vmatpush.bf16.msra.mxu2 %v967_v1  ;;  %v966_v4 = vld [vmem:[#allocation9] sm:$0xff]  ;;  %vm259_vm2 = vcmask 64512   ;;  %s1209_s4 = smov 104   ;;  %s1210_s5 = smov 120  }
  0x1e   :  { %191 = vmatpush.bf16.msra.mxu1 %v964_v3  ;;  %v963_v5 = vld [vmem:[#allocation12] sm:$0xff]  ;;  %v960_v6 = vld [vmem:[#allocation4] sm:$0xff]  ;;  %s1211_s28 = smov 112   ;;  %v251_v30 = vld [vmem:[#allocation7] sm:$0x1]  ;;  %vm295_vm3 = vcmask 1043456  }
  0x1f   :  { %v965_v7 = vld [vmem:[#allocation4] sm:$0xff]  ;;  %v252_v34 = vsub.f32 1.0, %v251_v30  ;;  %s1212_s29 = smov 8   ;;  %s1213_s30 = smov 24   ;;  %vm522_vm4 = vcmask 130048   ;;  %vm525_vm5 = vcmask 195584  }
  0x20   :  { %s873_s10 = sshll.u32 %s1394_s6, 4  ;;  %s1215_s1 = smov 128   ;;  %s874_s10 = int_to_ptr.hbm [resolvable:$true] %s873_s10 }
  0x21   :  { %157 = vmatpush.bf16.msra.mxu0 %v961_v2  ;;  %242 = vmatpush.bf16.msra.mxu2 %v966_v4  ;;  %v253_v35 = vmul.f32 -1e+12, %v252_v34 }
  0x22   :  { %192 = vmatpush.bf16.msra.mxu1 %v963_v5 }
  0x23   :  { %v257_v37 = vperm.slane %v253_v35, 0 }
  0x24   :  { %903 = vmatmul.msk.bf16.vlgmr.msra.gmra.mxu0 %vm146_vm0, %v960_v6  ;;  %925 = vmatmul.msk.bf16.vlgmr.msra.gmra.mxu2 %vm146_vm0, %v965_v7 }
  0x25   :  { %912 = vmatmul.msk.bf16.vlgmr.msra.gmra.mxu1 %vm146_vm0, %v960_v6 }
  0xa1   :  { %v159_v8 = vpop.f32.mrf.mxu0 }
  0xa2   :  { %v164_v9 = vpack.c.bf16 %v159_v8, %v159_v8  ;;  %v194_v10 = vpop.f32.mrf.mxu1 }
  0xa3   :  { %v199_v11 = vpack.c.bf16 %v194_v10, %v194_v10 }
  0xa4   :  { %167 = vst.msk [vmem:[#allocation2] sm:$0xf] %vm166_vm1, %v164_v9 }
  0xa5   :  { %201 = vst.msk [vmem:[#allocation3] sm:$0xf] %vm166_vm1, %v199_v11 }
  0xa7   :  { %v244_v12 = vpop.f32.mrf.mxu2 }
  0xa8   :  { %v249_v14 = vpack.c.bf16 %v244_v12, %v244_v12 }
  0xa9   :  { %v161_v13 = vpop.f32.mrf.mxu0 }
  0xaa   :  { %v165_v15 = vpack.c.bf16 %v161_v13, %v161_v13  ;;  %v316_v17 = vunpack.c.l.b16 %v249_v14  ;;  %v196_v41 = vpop.f32.mrf.mxu1 }
  0xab   :  { %v254_v16 = vld [vmem:[#allocation2] sm:$0xf]  ;;  %v200_v42 = vpack.c.bf16 %v196_v41, %v196_v41 }
  0xac   :  { %168 = vst.msk [vmem:[#allocation2 + $0x4] sm:$0xf] %vm166_vm1, %v165_v15  ;;  %v264_v18 = vsel %vm259_vm2, %v254_v16, 0  ;;  %v321_v19 = vunpack.c.l.b16 %v254_v16  ;;  %v317_v20 = vpack.c.b16 %v316_v17, %v316_v17  ;;  %v255_v22 = vld [vmem:[#allocation3] sm:$0xf] }
  0xad   :  { %273 = vmatpush.bf16.xpose.msra.mxu3 %v264_v18  ;;  %v358_v23 = vunpack.c.l.b16 %v255_v22  ;;  %v297_v43 = vsel %vm295_vm3, %v255_v22, 0  ;;  %202 = vst.msk [vmem:[#allocation3 + $0x4] sm:$0xf] %vm166_vm1, %v200_v42 }
  0xae   :  { %v322_v21 = vpack.c.b16 %v321_v19, %v321_v19  ;;  %444 = vrot.lane.b32.xlu2 %v317_v20, %s1209_s4  ;;  %306 = vmatpush.bf16.msrb.mxu0 %v297_v43 }
  0xaf   :  { %v1285_v24 = vpack.c.b16 %v358_v23, %v358_v23  ;;  %v246_v46 = vpop.f32.mrf.mxu2 }
  0xb0   :  { %446 = vrot.lane.b32.xlu1 %v322_v21, %s1209_s4  ;;  %323 = vrot.lane.b32.xlu0 %v322_v21, %s1210_s5  ;;  %v1304_v48 = vpack.c.bf16 %v246_v46, %v246_v46 }
  0xb2   :  { %v624_v49 = vunpack.c.l.b16 %v1304_v48 }
  0xb3   :  { %v1307_v51 = vld [vmem:[#allocation2 + $0x4] sm:$0xf] }
  0xb4   :  { %926 = vmatmul.msk.bf16.vlgmr.msra.gmra.mxu3 %vm259_vm2, %v249_v14  ;;  %v1300_v45 = vld [vmem:[#allocation3 + $0x4] sm:$0xf]  ;;  %v625_v50 = vpack.c.b16 %v624_v49, %v624_v49  ;;  %v629_v52 = vunpack.c.l.b16 %v1307_v51 }
  0xb5   :  { %v605_v47 = vsel %vm295_vm3, %v1300_v45, 0 }
  0xb6   :  { %384 = vrot.lane.b32.xlu2 %v317_v20, %s1211_s28  ;;  %v630_v53 = vpack.c.b16 %v629_v52, %v629_v52 }
  0xb8   :  { %386 = vrot.lane.b32.xlu1 %v322_v21, %s1211_s28  ;;  %318 = vrot.lane.b32.xlu0 %v317_v20, %s1210_s5 }
  0xbe   :  { %360 = vrot.lane.b32.xlu2 %v1285_v24, %s1210_s5 }
  0xc0   :  { %480 = vrot.lane.b32.xlu1 %v1285_v24, %s1209_s4 }
 0x108   :  { %v445_v29 = vpop.permute.xlu2 %444 }
 0x110   :  { %v385_v36 = vpop.permute.xlu2 %384 }
 0x118   :  { %v361_v6 = vpop.permute.xlu2 %360 }
 0x119   :  { %v366_v11 = vsel %vm295_vm3, %v361_v6, 0  ;;  %v666_v6 = vunpack.c.l.b16 %v1300_v45 }
 0x11a   :  { %375 = vmatpush.bf16.msrb.mxu2 %v366_v11 }
 0x122   :  { %v447_v25 = vpop.permute.xlu1 %446  ;;  %v324_v26 = vpop.permute.xlu0 %323 }
 0x123   :  { %v452_v27 = vsel %vm259_vm2, %v447_v25, 0  ;;  %v329_v28 = vsel %vm259_vm2, %v324_v26, 0 }
 0x124   :  { %338 = vmatpush.bf16.xpose.msrb.mxu1 %v329_v28 }
 0x12a   :  { %v387_v31 = vpop.permute.xlu1 %386  ;;  %v319_v32 = vpop.permute.xlu0 %318 }
 0x12b   :  { %928 = vmatmul.msk.bf16.vlgmr.msrb.gmra.mxu1 %vm259_vm2, %v319_v32  ;;  %v392_v33 = vsel %vm259_vm2, %v387_v31, 0 }
 0x12c   :  { %461 = vmatpush.bf16.xpose.msra.mxu1 %v452_v27  ;;  %401 = vmatpush.bf16.xpose.msrb.mxu3 %v392_v33 }
 0x132   :  { %v481_v54 = vpop.permute.xlu1 %480 }
 0x133   :  { %930 = vmatmul.msk.bf16.vlgmr.msrb.gmra.mxu3 %vm259_vm2, %v385_v36  ;;  %v486_v8 = vsel %vm295_vm3, %v481_v54, 0  ;;  %v573_v36 = vsel %vm259_vm2, %v1307_v51, 0 }
 0x134   :  { %614 = vmatpush.bf16.msrb.mxu1 %v605_v47  ;;  %495 = vmatpush.bf16.msra.mxu2 %v486_v8  ;;  %v667_v8 = vpack.c.b16 %v666_v6, %v666_v6 }
 0x137   :  { %v275_v38 = vpop.f32.mrf.mxu3 }
 0x138   :  { %v276_v39 = vadd.f32 %v275_v38, %v257_v37 }
 0x13a   :  { %v279_v40 = vsel %vm259_vm2, %v276_v39, -inf }
 0x13b   :  { %932 = vmatmul.msk.bf16.vlgmr.msra.gmra.mxu1 %vm259_vm2, %v445_v29  ;;  %280 = vmax.xlane.f32.xlu1 %v279_v40 }
 0x13f   :  { %v277_v44 = vpop.f32.mrf.mxu3 }
 0x154   :  { %626 = vrot.lane.b32.xlu1 %v625_v50, %s1210_s5 }
 0x15c   :  { %694 = vrot.lane.b32.xlu1 %v630_v53, %s1211_s28 }
 0x1a8   :  { %v340_v55 = vpop.f32.mrf.mxu1 }
 0x1a9   :  { %v341_v56 = vadd.f32 %v340_v55, %v257_v37 }
 0x1ab   :  { %v344_v57 = vsel %vm259_vm2, %v341_v56, -inf }
 0x1ac   :  { %345 = vmax.xlane.f32.xlu0 %v344_v57 }
 0x1ae   :  { %v281_v58 = vpop.xlane.xlu1 %280 }
 0x1af   :  { %v282_v59 = vsub.f32 %v276_v39, %v281_v58 }
 0x1b0   :  { %v342_v60 = vpop.f32.mrf.mxu1 }
 0x1b1   :  { %v283_v61 = vpack.c.bf16 %v282_v59, %v282_v59 }
 0x1b3   :  { %v284_v62 = vunpack.c.l.bf16 %v283_v61 }
 0x1b5   :  { %v285_v63 = vmul.f32 1.442695, %v284_v62 }
 0x1b6   :  { %v403_v0 = vpop.f32.mrf.mxu3 }
 0x1b7   :  { %989 = vpow2.f32 %v285_v63  ;;  %v404_v1 = vadd.f32 %v403_v0, %v257_v37 }
 0x1b8   :  { %v463_v2 = vpop.f32.mrf.mxu1 }
 0x1b9   :  { %v464_v3 = vadd.f32 %v463_v2, %v257_v37  ;;  %v407_v4 = vsel %vm259_vm2, %v404_v1, -inf }
 0x1ba   :  { %408 = vmax.xlane.f32.xlu0 %v407_v4 }
 0x1bb   :  { %v467_v5 = vsel %vm259_vm2, %v464_v3, -inf }
 0x1bc   :  { %468 = vmax.xlane.f32.xlu2 %v467_v5 }
 0x1bd   :  { %v990_v7 = vpop.eup %989 }
 0x1be   :  { %v287_v9 = vpack.c.bf16 %v990_v7, %v990_v7  ;;  %v405_v10 = vpop.f32.mrf.mxu3 }
 0x1c0   :  { %927 = vmatmul.msk.bf16.vlgmr.msrb.gmra.mxu0 %vm259_vm2, %v287_v9  ;;  %v465_v12 = vpop.f32.mrf.mxu1  ;;  %v288_v34 = vunpack.c.l.bf16 %v287_v9 }
 0x1c1   :  { %v561_v12 = vld [vmem:[#allocation7 + $0x1] sm:$0x1] }
 0x1c2   :  { %v289_v37 = vsel %vm259_vm2, %v288_v34, 0.0 }
 0x1c6   :  { %v627_v26 = vpop.permute.xlu1 %626 }
 0x1ce   :  { %631 = vrot.lane.b32.xlu0 %v630_v53, %s1210_s5  ;;  %v695_v39 = vpop.permute.xlu1 %694 }
 0x1cf   :  { %v700_v43 = vsel %vm259_vm2, %v695_v39, 0 }
 0x1d4   :  { %420 = vrot.lane.b32.xlu2 %v1285_v24, %s1211_s28 }
 0x1d6   :  { %754 = vrot.lane.b32.xlu0 %v630_v53, %s1209_s4 }
 0x1dc   :  { %752 = vrot.lane.b32.xlu2 %v625_v50, %s1209_s4 }
 0x1de   :  { %692 = vrot.lane.b32.xlu0 %v625_v50, %s1211_s28 }
 0x21f   :  { %v346_v13 = vpop.xlane.xlu0 %345 }
 0x220   :  { %v347_v14 = vsub.f32 %v341_v56, %v346_v13  ;;  %v562_v13 = vsub.f32 1.0, %v561_v12 }
 0x222   :  { %v348_v15 = vpack.c.bf16 %v347_v14, %v347_v14 }
 0x224   :  { %v349_v16 = vunpack.c.l.bf16 %v348_v15 }
 0x226   :  { %v350_v17 = vmul.f32 1.442695, %v349_v16  ;;  %v563_v16 = vmul.f32 -1e+12, %v562_v13 }
 0x228   :  { %991 = vpow2.f32 %v350_v17  ;;  %v567_v17 = vperm.slane %v563_v16, 0 }
 0x22d   :  { %v409_v18 = vpop.xlane.xlu0 %408 }
 0x22e   :  { %v992_v19 = vpop.eup %991  ;;  %v410_v20 = vsub.f32 %v404_v1, %v409_v18 }
 0x22f   :  { %v352_v21 = vpack.c.bf16 %v992_v19, %v992_v19  ;;  %v469_v22 = vpop.xlane.xlu2 %468 }
 0x230   :  { %v411_v23 = vpack.c.bf16 %v410_v20, %v410_v20  ;;  %v470_v25 = vsub.f32 %v464_v3, %v469_v22 }
 0x231   :  { %929 = vmatmul.msk.bf16.vlgmr.msrb.gmra.mxu2 %vm259_vm2, %v352_v21  ;;  %v353_v24 = vunpack.c.l.bf16 %v352_v21 }
 0x232   :  { %v412_v27 = vunpack.c.l.bf16 %v411_v23  ;;  %v471_v28 = vpack.c.bf16 %v470_v25, %v470_v25 }
 0x233   :  { %v354_v29 = vsel %vm259_vm2, %v353_v24, 0.0 }
 0x234   :  { %v413_v30 = vmul.f32 1.442695, %v412_v27  ;;  %v472_v31 = vunpack.c.l.bf16 %v471_v28  ;;  %355 = vadd.xlane.f32.xlu2 %v354_v29 }
 0x236   :  { %993 = vpow2.f32 %v413_v30  ;;  %v473_v32 = vmul.f32 1.442695, %v472_v31 }
 0x237   :  { %v421_v33 = vpop.permute.xlu2 %420 }
 0x238   :  { %995 = vpow2.f32 %v473_v32  ;;  %v426_v35 = vsel %vm295_vm3, %v421_v33, 0 }
 0x239   :  { %435 = vmatpush.bf16.msra.mxu0 %v426_v35 }
 0x23c   :  { %v994_v38 = vpop.eup %993  ;;  %290 = vadd.xlane.f32.xlu2 %v289_v37 }
 0x23d   :  { %582 = vmatpush.bf16.xpose.msrb.mxu0 %v573_v36  ;;  %v415_v40 = vpack.c.bf16 %v994_v38, %v994_v38  ;;  %v1330_v41 = vpop.f32.mrf.mxu0  ;;  %v969_v36 = vld [vmem:[#allocation13 + $0x8] sm:$0xff]  ;;  %v968_v38 = vld [vmem:[#allocation13] sm:$0xff] }
 0x23e   :  { %v996_v42 = vpop.eup %995  ;;  %552 = vmatpush.bf16.msra.mxu3 %v969_v36 }
 0x23f   :  { %v475_v44 = vpack.c.bf16 %v996_v42, %v996_v42  ;;  %931 = vmatmul.msk.bf16.vlgmr.msra.gmra.mxu0 %vm259_vm2, %v415_v40  ;;  %v416_v46 = vunpack.c.l.bf16 %v415_v40  ;;  %v753_v57 = vpop.permute.xlu2 %752 }
 0x240   :  { %v632_v47 = vpop.permute.xlu0 %631 }
 0x241   :  { %v637_v49 = vsel %vm259_vm2, %v632_v47, 0  ;;  %933 = vmatmul.msk.bf16.vlgmr.msra.gmra.mxu2 %vm259_vm2, %v475_v44  ;;  %v417_v50 = vsel %vm259_vm2, %v416_v46, 0.0  ;;  %v476_v51 = vunpack.c.l.bf16 %v475_v44 }
 0x242   :  { %418 = vadd.xlane.f32.xlu1 %v417_v50  ;;  %646 = vmatpush.bf16.xpose.msrb.mxu2 %v637_v49 }
 0x243   :  { %v477_v52 = vsel %vm259_vm2, %v476_v51, 0.0  ;;  %553 = vmatpush.bf16.msra.mxu3 %v968_v38 }
 0x244   :  { %478 = vadd.xlane.f32.xlu0 %v477_v52 }
 0x245   :  { %709 = vmatpush.bf16.xpose.msra.mxu0 %v700_v43  ;;  %v310_v53 = vpop.f32.mrf.mxu0 }
 0x248   :  { %v755_v54 = vpop.permute.xlu0 %754 }
 0x249   :  { %v760_v55 = vsel %vm259_vm2, %v755_v54, 0 }
 0x24a   :  { %769 = vmatpush.bf16.xpose.msra.mxu2 %v760_v55 }
 0x24f   :  { %943 = vmatmul.msk.bf16.vlgmr.msrb.gmra.mxu0 %vm259_vm2, %v1304_v48 }
 0x250   :  { %v693_v56 = vpop.permute.xlu0 %692 }
 0x251   :  { %945 = vmatmul.msk.bf16.vlgmr.msrb.gmra.mxu2 %vm259_vm2, %v627_v26 }
 0x25f   :  { %947 = vmatmul.msk.bf16.vlgmr.msra.gmra.mxu0 %vm259_vm2, %v693_v56 }
 0x261   :  { %949 = vmatmul.msk.bf16.vlgmr.msra.gmra.mxu2 %vm259_vm2, %v753_v57 }
 0x2a7   :  { %v356_v58 = vpop.xlane.xlu2 %355 }
 0x2a8   :  { %997 = vrcp.f32 %v356_v58 }
 0x2ae   :  { %v998_v59 = vpop.eup %997 }
 0x2af   :  { %v291_v44 = vpop.xlane.xlu2 %290 }
 0x2b4   :  { %v377_v60 = vpop.f32.mrf.mxu2 }
 0x2b5   :  { %v382_v61 = vmul.f32 %v998_v59, %v377_v60  ;;  %v419_v62 = vpop.xlane.xlu1 %418 }
 0x2b6   :  { %999 = vrcp.f32 %v419_v62 }
 0x2b7   :  { %v383_v63 = vpack.c.bf16 %v382_v61, %v382_v61  ;;  %v479_v21 = vpop.xlane.xlu0 %478 }
 0x2b8   :  { %1001 = vrcp.f32 %v479_v21 }
 0x2b9   :  { %v505_v0 = vunpack.c.l.b16 %v383_v63  ;;  %1003 = vrcp.f32 %v291_v44 }
 0x2bb   :  { %v506_v1 = vpack.c.b16 %v505_v0, %v505_v0 }
 0x2bc   :  { %v1000_v2 = vpop.eup %999  ;;  %v379_v48 = vpop.f32.mrf.mxu2 }
 0x2bd   :  { %v437_v3 = vpop.f32.mrf.mxu0  ;;  %507 = vrot.lane.b32.xlu1 %v506_v1, %s1212_s29 }
 0x2be   :  { %v442_v4 = vmul.f32 %v1000_v2, %v437_v3  ;;  %v1002_v25 = vpop.eup %1001 }
 0x2bf   :  { %v1004_v46 = vpop.eup %1003 }
 0x2c0   :  { %v443_v5 = vpack.c.bf16 %v442_v4, %v442_v4  ;;  %v313_v49 = vmul.f32 %v1004_v46, %v1330_v41 }
 0x2c2   :  { %v510_v7 = vunpack.c.l.b16 %v443_v5  ;;  %v314_v52 = vpack.c.bf16 %v313_v49, %v313_v49 }
 0x2c4   :  { %v511_v9 = vpack.c.b16 %v510_v7, %v510_v7  ;;  %v497_v11 = vpop.f32.mrf.mxu2 }
 0x2c5   :  { %v439_v10 = vpop.f32.mrf.mxu0  ;;  %668 = vrot.lane.b32.xlu1 %v667_v8, %s1210_s5  ;;  %v502_v24 = vmul.f32 %v1002_v25, %v497_v11 }
 0x2c6   :  { %512 = vrot.lane.b32.xlu0 %v511_v9, %s1200_s26 }
 0x2c7   :  { %v503_v28 = vpack.c.bf16 %v502_v24, %v502_v24 }
 0x2c9   :  { %v515_v29 = vunpack.c.l.b16 %v503_v28 }
 0x2cb   :  { %v516_v33 = vpack.c.b16 %v515_v29, %v515_v29 }
 0x2cc   :  { %v499_v14 = vpop.f32.mrf.mxu2 }
 0x2cd   :  { %v584_v15 = vpop.f32.mrf.mxu0 }
 0x2ce   :  { %v585_v30 = vadd.f32 %v584_v15, %v567_v17 }
 0x2d0   :  { %v588_v35 = vsel %vm259_vm2, %v585_v30, -inf }
 0x2d4   :  { %v648_v19 = vpop.f32.mrf.mxu2 }
 0x2d5   :  { %v586_v18 = vpop.f32.mrf.mxu0  ;;  %v649_v20 = vadd.f32 %v648_v19, %v567_v17 }
 0x2d7   :  { %v652_v45 = vsel %vm259_vm2, %v649_v20, -inf }
 0x2d8   :  { %653 = vmax.xlane.f32.xlu2 %v652_v45 }
 0x2dc   :  { %v650_v22 = vpop.f32.mrf.mxu2 }
 0x2dd   :  { %v711_v23 = vpop.f32.mrf.mxu0 }
 0x2de   :  { %v1354_v37 = vadd.f32 %v711_v23, %v567_v17 }
 0x2e0   :  { %v715_v39 = vsel %vm259_vm2, %v1354_v37, -inf }
 0x2e4   :  { %v771_v27 = vpop.f32.mrf.mxu2 }
 0x2e5   :  { %v713_v26 = vpop.f32.mrf.mxu0  ;;  %v772_v31 = vadd.f32 %v771_v27, %v567_v17 }
 0x2e7   :  { %v775_v34 = vsel %vm259_vm2, %v772_v31, -inf }
 0x2ec   :  { %v773_v32 = vpop.f32.mrf.mxu2 }
 0x2ef   :  { %776 = vmax.xlane.f32.xlu1 %v775_v34 }
 0x2f0   :  { %589 = vmax.xlane.f32.xlu0 %v588_v35  ;;  %517 = vrot.lane.b32.xlu2 %v516_v33, %s1213_s30 }
 0x304   :  { %788 = vrot.lane.b32.xlu0 %v667_v8, %s1209_s4 }
 0x308   :  { %728 = vrot.lane.b32.xlu1 %v667_v8, %s1211_s28 }
 0x319   :  { %716 = vmax.xlane.f32.xlu2 %v715_v39 }
 0x32f   :  { %v508_v40 = vpop.permute.xlu1 %507 }
 0x330   :  { %v521_v55 = vsel %vm259_vm2, %v314_v52, %v508_v40 }
 0x337   :  { %v669_v42 = vpop.permute.xlu1 %668 }
 0x338   :  { %v674_v43 = vsel %vm295_vm3, %v669_v42, 0  ;;  %v513_v53 = vpop.permute.xlu0 %512 }
 0x339   :  { %683 = vmatpush.bf16.msrb.mxu3 %v674_v43  ;;  %v524_v57 = vsel %vm522_vm4, %v521_v55, %v513_v53 }
 0x34b   :  { %v654_v47 = vpop.xlane.xlu2 %653 }
 0x34c   :  { %v655_v50 = vsub.f32 %v649_v20, %v654_v47 }
 0x34e   :  { %v656_v51 = vpack.c.bf16 %v655_v50, %v655_v50 }
 0x350   :  { %v657_v54 = vunpack.c.l.bf16 %v656_v51 }
 0x352   :  { %v658_v56 = vmul.f32 1.442695, %v657_v54 }
 0x353   :  { %v518_v58 = vpop.permute.xlu2 %517 }
 0x354   :  { %1005 = vpow2.f32 %v658_v56  ;;  %v527_v59 = vsel %vm525_vm5, %v524_v57, %v518_v58 }
 0x355   :  { %942 = vmatmul.msk.bf16.vlgmr.msra.gmra.mxu3 %vm146_vm0, %v527_v59  ;;  %v971_v59 = vld [vmem:[#allocation13 + $0x8] sm:$0xff] }
 0x356   :  { %858 = vmatpush.bf16.msrb.mxu0 %v971_v59 }
 0x35a   :  { %v1006_v60 = vpop.eup %1005 }
 0x35b   :  { %v660_v41 = vpack.c.bf16 %v1006_v60, %v1006_v60  ;;  %v970_v60 = vld [vmem:[#allocation13] sm:$0xff] }
 0x35c   :  { %859 = vmatpush.bf16.msrb.mxu0 %v970_v60 }
 0x35d   :  { %v661_v61 = vunpack.c.l.bf16 %v660_v41 }
 0x35f   :  { %v662_v62 = vsel %vm259_vm2, %v661_v61, 0.0 }
 0x360   :  { %663 = vadd.xlane.f32.xlu2 %v662_v62 }
 0x362   :  { %v777_v63 = vpop.xlane.xlu1 %776 }
 0x363   :  { %v590_v0 = vpop.xlane.xlu0 %589  ;;  %v778_v1 = vsub.f32 %v772_v31, %v777_v63 }
 0x364   :  { %v591_v2 = vsub.f32 %v585_v30, %v590_v0 }
 0x365   :  { %v779_v48 = vpack.c.bf16 %v778_v1, %v778_v1  ;;  %946 = vmatmul.msk.bf16.vlgmr.msrb.gmra.mxu3 %vm259_vm2, %v660_v41 }
 0x366   :  { %v592_v3 = vpack.c.bf16 %v591_v2, %v591_v2 }
 0x367   :  { %v780_v4 = vunpack.c.l.bf16 %v779_v48 }
 0x368   :  { %v593_v5 = vunpack.c.l.bf16 %v592_v3 }
 0x369   :  { %v781_v6 = vmul.f32 1.442695, %v780_v4 }
 0x36a   :  { %v594_v7 = vmul.f32 1.442695, %v593_v5 }
 0x36b   :  { %1007 = vpow2.f32 %v781_v6 }
 0x36c   :  { %1009 = vpow2.f32 %v594_v7 }
 0x371   :  { %v1008_v8 = vpop.eup %1007 }
 0x372   :  { %v1010_v9 = vpop.eup %1009  ;;  %v783_v10 = vpack.c.bf16 %v1008_v8, %v1008_v8 }
 0x373   :  { %v596_v11 = vpack.c.bf16 %v1010_v9, %v1010_v9 }
 0x374   :  { %v784_v12 = vunpack.c.l.bf16 %v783_v10 }
 0x375   :  { %944 = vmatmul.msk.bf16.vlgmr.msrb.gmra.mxu1 %vm259_vm2, %v596_v11  ;;  %v597_v17 = vunpack.c.l.bf16 %v596_v11 }
 0x376   :  { %v789_v13 = vpop.permute.xlu0 %788  ;;  %v785_v15 = vsel %vm259_vm2, %v784_v12, 0.0 }
 0x377   :  { %v794_v14 = vsel %vm295_vm3, %v789_v13, 0  ;;  %786 = vadd.xlane.f32.xlu2 %v785_v15  ;;  %v598_v19 = vsel %vm259_vm2, %v597_v17, 0.0 }
 0x378   :  { %803 = vmatpush.bf16.msra.mxu3 %v794_v14 }
 0x37a   :  { %v729_v16 = vpop.permute.xlu1 %728 }
 0x37b   :  { %950 = vmatmul.msk.bf16.vlgmr.msra.gmra.mxu3 %vm259_vm2, %v783_v10  ;;  %v734_v18 = vsel %vm295_vm3, %v729_v16, 0 }
 0x37c   :  { %743 = vmatpush.bf16.msra.mxu1 %v734_v18 }
 0x37f   :  { %599 = vadd.xlane.f32.xlu2 %v598_v19 }
 0x38c   :  { %v717_v20 = vpop.xlane.xlu2 %716 }
 0x38d   :  { %v718_v45 = vsub.f32 %v1354_v37, %v717_v20 }
 0x38f   :  { %v719_v21 = vpack.c.bf16 %v718_v45, %v718_v45 }
 0x391   :  { %v720_v22 = vunpack.c.l.bf16 %v719_v21 }
 0x393   :  { %v721_v23 = vmul.f32 1.442695, %v720_v22 }
 0x395   :  { %1011 = vpow2.f32 %v721_v23 }
 0x39b   :  { %v1012_v25 = vpop.eup %1011 }
 0x39c   :  { %v723_v24 = vpack.c.bf16 %v1012_v25, %v1012_v25 }
 0x39e   :  { %948 = vmatmul.msk.bf16.vlgmr.msra.gmra.mxu1 %vm259_vm2, %v723_v24  ;;  %v724_v26 = vunpack.c.l.bf16 %v723_v24 }
 0x3a0   :  { %v725_v27 = vsel %vm259_vm2, %v724_v26, 0.0 }
 0x3a1   :  { %726 = vadd.xlane.f32.xlu0 %v725_v27 }
 0x3d3   :  { %v664_v29 = vpop.xlane.xlu2 %663 }
 0x3d4   :  { %1013 = vrcp.f32 %v664_v29 }
 0x3d8   :  { %v555_v28 = vpop.f32.mrf.mxu3 }
 0x3d9   :  { %559 = vst.msk [vmem:[#allocation15] sm:$0xff] %vm146_vm0, %v555_v28 }
 0x3da   :  { %v1014_v31 = vpop.eup %1013 }
 0x3e0   :  { %v557_v30 = vpop.f32.mrf.mxu3 }
 0x3e8   :  { %v685_v32 = vpop.f32.mrf.mxu3 }
 0x3e9   :  { %v690_v33 = vmul.f32 %v1014_v31, %v685_v32 }
 0x3ea   :  { %v787_v39 = vpop.xlane.xlu2 %786 }
 0x3eb   :  { %v691_v34 = vpack.c.bf16 %v690_v33, %v690_v33  ;;  %1015 = vrcp.f32 %v787_v39 }
 0x3ed   :  { %v813_v35 = vunpack.c.l.b16 %v691_v34 }
 0x3ef   :  { %v814_v36 = vpack.c.b16 %v813_v35, %v813_v35 }
 0x3f0   :  { %v687_v37 = vpop.f32.mrf.mxu3 }
 0x3f1   :  { %815 = vrot.lane.b32.xlu1 %v814_v36, %s1212_s29  ;;  %v1016_v42 = vpop.eup %1015 }
 0x3f2   :  { %v616_v38 = vpop.f32.mrf.mxu1  ;;  %v600_v41 = vpop.xlane.xlu2 %599 }
 0x3fa   :  { %v618_v40 = vpop.f32.mrf.mxu1 }
 0x3fe   :  { %v805_v43 = vpop.f32.mrf.mxu3 }
 0x3ff   :  { %v810_v44 = vmul.f32 %v1016_v42, %v805_v43 }
 0x401   :  { %v811_v46 = vpack.c.bf16 %v810_v44, %v810_v44 }
 0x403   :  { %v823_v47 = vunpack.c.l.b16 %v811_v46 }
 0x405   :  { %v824_v49 = vpack.c.b16 %v823_v47, %v823_v47 }
 0x406   :  { %v807_v50 = vpop.f32.mrf.mxu3 }
 0x407   :  { %825 = vrot.lane.b32.xlu1 %v824_v49, %s1213_s30 }
 0x414   :  { %v727_v51 = vpop.xlane.xlu0 %726 }
 0x415   :  { %1017 = vrcp.f32 %v727_v51 }
 0x416   :  { %1019 = vrcp.f32 %v600_v41 }
 0x41b   :  { %v1018_v52 = vpop.eup %1017  ;;  %v745_v53 = vpop.f32.mrf.mxu1 }
 0x41c   :  { %v750_v54 = vmul.f32 %v1018_v52, %v745_v53  ;;  %v1020_v61 = vpop.eup %1019 }
 0x41d   :  { %v621_v63 = vmul.f32 %v1020_v61, %v616_v38 }
 0x41e   :  { %v751_v55 = vpack.c.bf16 %v750_v54, %v750_v54 }
 0x41f   :  { %v622_v0 = vpack.c.bf16 %v621_v63, %v621_v63 }
 0x420   :  { %v818_v56 = vunpack.c.l.b16 %v751_v55 }
 0x422   :  { %v819_v57 = vpack.c.b16 %v818_v56, %v818_v56 }
 0x423   :  { %v747_v58 = vpop.f32.mrf.mxu1 }
 0x424   :  { %820 = vrot.lane.b32.xlu2 %v819_v57, %s1200_s26  ;;  %s1214_s26 = smov [#allocation15]  }
 0x425   :  { %s871_s7 = sshll.u32 %s1214_s26, 4  ;;  %s872_s7 = int_to_ptr.vmem [resolvable:$true] %s871_s7 }
 0x463   :  { %v816_v62 = vpop.permute.xlu1 %815 }
 0x464   :  { %v829_v1 = vsel %vm259_vm2, %v622_v0, %v816_v62 }
 0x479   :  { %v826_v48 = vpop.permute.xlu1 %825 }
 0x47e   :  { %v821_v2 = vpop.permute.xlu2 %820 }
 0x47f   :  { %v831_v3 = vsel %vm522_vm4, %v829_v1, %v821_v2 }
 0x480   :  { %v833_v4 = vsel %vm525_vm5, %v831_v3, %v826_v48 }
 0x481   :  { %959 = vmatmul.msk.bf16.vlgmr.msrb.gmra.mxu0 %vm146_vm0, %v833_v4 }
 0x4fe   :  { %v861_v5 = vpop.f32.mrf.mxu0 }
 0x4ff   :  { %866 = vst.msk [vmem:[#allocation15 + $0x8] sm:$0xff] %vm146_vm0, %v861_v5 }
 0x500   :  { %879 = dma.vmem_to_hbm [thread:$0]  %s872_s7, 256, %s874_s10, [#allocation6], %s1215_s1, %s1215_s1, %s1212_s29  }
 0x506   :  { %v863_v6 = vpop.f32.mrf.mxu0 }
 0x507   :  { %1197 = dma.done.wait [#allocation6], 256  }
 0x508   :  { %1198 = vsyncadd [#allocation6], 4294967040 }
 0x509   :  { %884 = vsyncpa [#allocation5], 1 }
 0x50a   :  { %885 = vsyncpa [#allocation8], 1 }
 0x50b   :  { %886 = vsyncpa [#allocation11], 1 }
 0x50c   :  { %887 = vsyncpa [#allocation14], 1 }
 0x50d   :  { %888 = vsyncpa [#allocation6], 1 }

</bundles_post_ra>
